<compile_context>
chip_gen: v7x
topology: tpu7x:2x2x1
jax: 0.10.0
libtpu: 0.0.40
codegen_flags: <defaults>
</compile_context>

<pallas_src>
import jax
import jax.numpy as jnp
from jax.experimental import pallas as pl
from jax.experimental.pallas import tpu as pltpu

EPS = 1e-5  # PyTorch InstanceNorm2d default

# > 16/32 MiB scoped defaults, < 64 MiB v7x physical VMEM.  For production
# C>=128 feature maps on v5e/v6e (128 MiB physical) this can be raised to
# ~100 MiB.
VMEM_LIMIT_BYTES = 48 * 1024 * 1024


def _resnet_block_kernel(x_ref, w1_ref, b1_ref, w2_ref, b2_ref, o_ref):
    """One batch element per grid step.

    x_ref : (1, H, W, C)  input tile (NHWC)
    w*_ref: (3, 3C, C)    bf16 conv weights, [dy, dx*C + cin, cout]
    b*_ref: (1, C)        f32 conv biases
    o_ref : (1, H, W, C)  output tile
    """
    H, W, C = x_ref.shape[1], x_ref.shape[2], x_ref.shape[3]
    x = x_ref[0].astype(jnp.float32)  # (H, W, C)

    def conv3x3_in(y, w_ref, b_ref):
        # ReflectionPad2d(1) along H: leading-axis concat (no relayout).
        yv = jnp.concatenate([y[1:2], y, y[H - 2:H - 1]], axis=0)  # (H+2, W, C)
        # dx-shifted views with reflection at the W edges; the two sublane
        # relayouts happen once per conv instead of once per tap.
        s_l = jnp.concatenate([yv[:, 1:2, :], yv[:, :W - 1, :]], axis=1)      # dx=0
        s_r = jnp.concatenate([yv[:, 1:, :], yv[:, W - 2:W - 1, :]], axis=1)  # dx=2
        # Fuse the 3 dx taps into the contraction dim: (H+2, W, 3C), bf16 for
        # the MXU (accumulation stays f32).
        slab = jnp.concatenate(
            [s_l.astype(jnp.bfloat16), yv.astype(jnp.bfloat16),
             s_r.astype(jnp.bfloat16)], axis=-1)

        acc = jnp.zeros((H * W, C), jnp.float32)
        for dy in range(3):  # 3 MXU matmuls with K = 3C
            patch = slab[dy:dy + H].reshape(H * W, 3 * C)
            acc = acc + jnp.dot(patch, w_ref[dy],
                                preferred_element_type=jnp.float32)
        yc = acc.reshape(H, W, C) + b_ref[...].astype(jnp.float32).reshape(1, 1, C)

        # InstanceNorm2d (affine=False, eps=1e-5), biased variance, one pass.
        mean = jnp.mean(yc, axis=(0, 1), keepdims=True)
        var = jnp.mean(yc * yc, axis=(0, 1), keepdims=True) - mean * mean
        return (yc - mean) * jax.lax.rsqrt(var + EPS)

    h1 = jnp.maximum(conv3x3_in(x, w1_ref, b1_ref), 0.0)
    # TODO(synk): Dropout(0.5) path (use_dropout=True) not implemented.
    h2 = conv3x3_in(h1, w2_ref, b2_ref)
    o_ref[0] = (x + h2).astype(o_ref.dtype)


def resnet_block_nhwc(x_nhwc, w1, b1, w2, b2):
    """x_nhwc: (N, H, W, C); w*: (Cout, Cin, 3, 3) PyTorch layout; b*: (C,)."""
    N, H, W, C = x_nhwc.shape
    assert H >= 2 and W >= 2, "ReflectionPad2d(1) requires H, W >= 2"

    def to_taps(w):  # (O, I, 3, 3) -> (3, 3C, C): [dy, dx*C + cin, cout]
        return jnp.transpose(w, (2, 3, 1, 0)).reshape(3, 3 * C, C)

    # bf16 weights feed the MXU directly and halve the weight DMA.
    w1_t = to_taps(w1).astype(jnp.bfloat16)
    w2_t = to_taps(w2).astype(jnp.bfloat16)
    b1_r = b1.reshape(1, C).astype(jnp.float32)
    b2_r = b2.reshape(1, C).astype(jnp.float32)

    # TODO(synk): for large H*W*C (esp. v7x 64 MiB VMEM), tile over H with a
    # 1-row halo + two-pass InstanceNorm; whole-image-per-step is kept since
    # it fits typical CycleGAN feature maps and the sizes used here.
    # TODO(synk): for C < 128 a lane-dense repack (W*C on lanes) would avoid
    # masked stores; NHWC kept because production blocks use C >= 128.
    return pl.pallas_call(
        _resnet_block_kernel,
        out_shape=jax.ShapeDtypeStruct((N, H, W, C), x_nhwc.dtype),
        grid=(N,),
        in_specs=[
            pl.BlockSpec((1, H, W, C), lambda n: (n, 0, 0, 0)),
            pl.BlockSpec((3, 3 * C, C), lambda n: (0, 0, 0)),
            pl.BlockSpec((1, C), lambda n: (0, 0)),
            pl.BlockSpec((3, 3 * C, C), lambda n: (0, 0, 0)),
            pl.BlockSpec((1, C), lambda n: (0, 0)),
        ],
        out_specs=pl.BlockSpec((1, H, W, C), lambda n: (n, 0, 0, 0)),
        input_output_aliases={0: 0},  # write the result over x's HBM buffer
        compiler_params=pltpu.CompilerParams(
            dimension_semantics=("parallel",),
            vmem_limit_bytes=VMEM_LIMIT_BYTES),
    )(x_nhwc, w1_t, b1_r, w2_t, b2_r)


@jax.jit
def resnet_block(x_nchw, w1, b1, w2, b2):
    """NCHW wrapper matching the PyTorch module.  When stacking 6-9 blocks,
    call resnet_block_nhwc directly and transpose once outside the stack to
    avoid per-block NCHW<->NHWC HBM round-trips."""
    x = jnp.transpose(x_nchw, (0, 2, 3, 1))  # NCHW -> NHWC
    out = resnet_block_nhwc(x, w1, b1, w2, b2)
    return jnp.transpose(out, (0, 3, 1, 2))  # NHWC -> NCHW


# ----------------------- pure-JAX references (self-check) -------------------
def _ref_resnet_block_f32(x_nchw, w1, b1, w2, b2):
    """Exact f32 semantics of the PyTorch module."""
    x = jnp.transpose(x_nchw, (0, 2, 3, 1)).astype(jnp.float32)
    C = x.shape[-1]

    def conv(y, w, b):
        yp = jnp.pad(y, ((0, 0), (1, 1), (1, 1), (0, 0)), mode="reflect")
        w_hwio = jnp.transpose(w, (2, 3, 1, 0))
        out = jax.lax.conv_general_dilated(
            yp, w_hwio, window_strides=(1, 1), padding="VALID",
            dimension_numbers=("NHWC", "HWIO", "NHWC"),
            precision=jax.lax.Precision.HIGHEST)
        return out + b.reshape(1, 1, 1, C)

    def inorm(y):
        mean = jnp.mean(y, axis=(1, 2), keepdims=True)
        var = jnp.mean((y - mean) ** 2, axis=(1, 2), keepdims=True)
        return (y - mean) * jax.lax.rsqrt(var + EPS)

    h = jnp.maximum(inorm(conv(x, w1, b1)), 0.0)
    h = inorm(conv(h, w2, b2))
    return jnp.transpose(x + h, (0, 3, 1, 2))


def _ref_resnet_block_mirror(x_nchw, w1, b1, w2, b2):
    """Pure-JAX mirror of the kernel numerics (bf16 MXU operands, f32 acc,
    one-pass variance) for a tight implementation check."""
    x = jnp.transpose(x_nchw, (0, 2, 3, 1)).astype(jnp.float32)
    N, H, W, C = x.shape

    def taps(w):
        t = jnp.transpose(w, (2, 3, 1, 0)).reshape(3, 3 * C, C)
        return t.astype(jnp.bfloat16).astype(jnp.float32)

    def conv_in(y, w_t, b):
        yv = jnp.concatenate([y[:, 1:2], y, y[:, H - 2:H - 1]], axis=1)
        s_l = jnp.concatenate([yv[:, :, 1:2], yv[:, :, :W - 1]], axis=2)
        s_r = jnp.concatenate([yv[:, :, 1:], yv[:, :, W - 2:W - 1]], axis=2)
        slab = jnp.concatenate([s_l, yv, s_r], axis=-1)
        slab = slab.astype(jnp.bfloat16).astype(jnp.float32)
        acc = jnp.zeros((N, H * W, C), jnp.float32)
        for dy in range(3):
            patch = slab[:, dy:dy + H].reshape(N, H * W, 3 * C)
            acc = acc + jnp.einsum("nkc,cd->nkd", patch, w_t[dy],
                                   precision=jax.lax.Precision.HIGHEST)
        yc = acc.reshape(N, H, W, C) + b.reshape(1, 1, 1, C)
        mean = jnp.mean(yc, axis=(1, 2), keepdims=True)
        var = jnp.mean(yc * yc, axis=(1, 2), keepdims=True) - mean * mean
        return (yc - mean) * jax.lax.rsqrt(var + EPS)

    h = jnp.maximum(conv_in(x, taps(w1), b1), 0.0)
    h = conv_in(h, taps(w2), b2)
    return jnp.transpose(x + h, (0, 3, 1, 2))


if __name__ == "__main__":
    N, C, H, W = 2, 4, 16, 16
    key = jax.random.PRNGKey(0)
    kx, kw1, kb1, kw2, kb2 = jax.random.split(key, 5)

    x = jax.random.normal(kx, (N, C, H, W), dtype=jnp.float32)
    w1 = jax.random.normal(kw1, (C, C, 3, 3), dtype=jnp.float32) * 0.1
    b1 = jax.random.normal(kb1, (C,), dtype=jnp.float32) * 0.1
    w2 = jax.random.normal(kw2, (C, C, 3, 3), dtype=jnp.float32) * 0.1
    b2 = jax.random.normal(kb2, (C,), dtype=jnp.float32) * 0.1

    out = jax.block_until_ready(resnet_block(x, w1, b1, w2, b2))
    assert out.shape == (N, C, H, W), out.shape

    # Tight check against a pure-JAX mirror of the kernel's numerics.
    mirror = jax.block_until_ready(_ref_resnet_block_mirror(x, w1, b1, w2, b2))
    err_m = float(jnp.max(jnp.abs(out - mirror)))
    assert err_m < 1e-2, f"mirror mismatch: {err_m}"

    # Loose semantic check vs the exact-f32 PyTorch-equivalent reference
    # (slack covers bf16 rounding of the MXU operands).
    ref = jax.block_until_ready(_ref_resnet_block_f32(x, w1, b1, w2, b2))
    err_f = float(jnp.max(jnp.abs(out - ref)))
    assert err_f < 1e-1, f"f32 reference mismatch: {err_f}"

    print("KERNEL_OK")
</pallas_src>

<mosaic_0001>
module attributes {stable_mosaic.version = 11 : i64} {
  func.func @_resnet_block_kernel(%arg0: i32, %arg1: memref<1x16x16x4xf32, #tpu.memory_space<vmem>>, %arg2: memref<3x12x4xbf16, #tpu.memory_space<vmem>>, %arg3: memref<1x4xf32, #tpu.memory_space<vmem>>, %arg4: memref<3x12x4xbf16, #tpu.memory_space<vmem>>, %arg5: memref<1x4xf32, #tpu.memory_space<vmem>>, %arg6: memref<1x16x16x4xf32, #tpu.memory_space<vmem>>) attributes {dimension_semantics = [#tpu.dimension_semantics<parallel>], iteration_bounds = array<i64: 2>, scalar_prefetch = 0 : i64, scratch_operands = 0 : i64, tpu.core_type = #tpu.core_type<tc>, window_params = [{transform_indices = @transform_0, window_bounds = array<i64: 1, 16, 16, 4>}, {pipeline_mode = #tpu.pipeline_mode<synchronous>, transform_indices = @transform_1, window_bounds = array<i64: 3, 12, 4>}, {pipeline_mode = #tpu.pipeline_mode<synchronous>, transform_indices = @transform_2, window_bounds = array<i64: 1, 4>}, {pipeline_mode = #tpu.pipeline_mode<synchronous>, transform_indices = @transform_3, window_bounds = array<i64: 3, 12, 4>}, {pipeline_mode = #tpu.pipeline_mode<synchronous>, transform_indices = @transform_4, window_bounds = array<i64: 1, 4>}, {transform_indices = @transform_5, window_bounds = array<i64: 1, 16, 16, 4>}]} {
    %c0 = arith.constant 0 : index
    %c0_0 = arith.constant 0 : index
    %c0_1 = arith.constant 0 : index
    %c0_2 = arith.constant 0 : index
    %0 = vector.load %arg1[%c0, %c0_0, %c0_1, %c0_2] : memref<1x16x16x4xf32, #tpu.memory_space<vmem>>, vector<1x16x16x4xf32>
    %1 = vector.shape_cast %0 : vector<1x16x16x4xf32> to vector<16x16x4xf32>
    %2 = vector.extract_strided_slice %1 {offsets = [1, 0, 0], sizes = [1, 16, 4], strides = [1, 1, 1]} : vector<16x16x4xf32> to vector<1x16x4xf32>
    %3 = vector.extract_strided_slice %1 {offsets = [14, 0, 0], sizes = [1, 16, 4], strides = [1, 1, 1]} : vector<16x16x4xf32> to vector<1x16x4xf32>
    %4 = tpu.concatenate %2, %1, %3 in 0 : vector<1x16x4xf32>, vector<16x16x4xf32>, vector<1x16x4xf32> -> vector<18x16x4xf32>
    %5 = vector.extract_strided_slice %4 {offsets = [0, 1, 0], sizes = [18, 1, 4], strides = [1, 1, 1]} : vector<18x16x4xf32> to vector<18x1x4xf32>
    %6 = vector.extract_strided_slice %4 {offsets = [0, 0, 0], sizes = [18, 15, 4], strides = [1, 1, 1]} : vector<18x16x4xf32> to vector<18x15x4xf32>
    %7 = tpu.concatenate %5, %6 in 1 : vector<18x1x4xf32>, vector<18x15x4xf32> -> vector<18x16x4xf32>
    %8 = vector.extract_strided_slice %4 {offsets = [0, 1, 0], sizes = [18, 15, 4], strides = [1, 1, 1]} : vector<18x16x4xf32> to vector<18x15x4xf32>
    %9 = vector.extract_strided_slice %4 {offsets = [0, 14, 0], sizes = [18, 1, 4], strides = [1, 1, 1]} : vector<18x16x4xf32> to vector<18x1x4xf32>
    %10 = tpu.concatenate %8, %9 in 1 : vector<18x15x4xf32>, vector<18x1x4xf32> -> vector<18x16x4xf32>
    %11 = arith.truncf %7 : vector<18x16x4xf32> to vector<18x16x4xbf16>
    %12 = arith.truncf %4 : vector<18x16x4xf32> to vector<18x16x4xbf16>
    %13 = arith.truncf %10 : vector<18x16x4xf32> to vector<18x16x4xbf16>
    %14 = tpu.concatenate %11, %12, %13 in 2 : vector<18x16x4xbf16>, vector<18x16x4xbf16>, vector<18x16x4xbf16> -> vector<18x16x12xbf16>
    %cst = arith.constant 0.000000e+00 : f32
    %15 = vector.broadcast %cst : f32 to vector<256x4xf32>
    %16 = vector.extract_strided_slice %14 {offsets = [0, 0, 0], sizes = [16, 16, 12], strides = [1, 1, 1]} : vector<18x16x12xbf16> to vector<16x16x12xbf16>
    %17 = vector.shape_cast %16 : vector<16x16x12xbf16> to vector<256x12xbf16>
    %c0_3 = arith.constant 0 : index
    %c0_4 = arith.constant 0 : index
    %c0_5 = arith.constant 0 : index
    %18 = vector.load %arg2[%c0_3, %c0_4, %c0_5] : memref<3x12x4xbf16, #tpu.memory_space<vmem>>, vector<1x12x4xbf16>
    %19 = vector.shape_cast %18 : vector<1x12x4xbf16> to vector<12x4xbf16>
    %cst_6 = arith.constant dense<0.000000e+00> : vector<256x4xf32>
    %20 = tpu.matmul %17, %19, %cst_6 {dimension_numbers = #tpu.dot_dimension_numbers<[1], [0], [0], [1], [0, 0, 1, 1], [], []>} : vector<256x12xbf16>, vector<12x4xbf16>, vector<256x4xf32> -> vector<256x4xf32>
    %21 = arith.addf %15, %20 : vector<256x4xf32>
    %22 = vector.extract_strided_slice %14 {offsets = [1, 0, 0], sizes = [16, 16, 12], strides = [1, 1, 1]} : vector<18x16x12xbf16> to vector<16x16x12xbf16>
    %23 = vector.shape_cast %22 : vector<16x16x12xbf16> to vector<256x12xbf16>
    %c1 = arith.constant 1 : index
    %c0_7 = arith.constant 0 : index
    %c0_8 = arith.constant 0 : index
    %24 = vector.load %arg2[%c1, %c0_7, %c0_8] : memref<3x12x4xbf16, #tpu.memory_space<vmem>>, vector<1x12x4xbf16>
    %25 = vector.shape_cast %24 : vector<1x12x4xbf16> to vector<12x4xbf16>
    %cst_9 = arith.constant dense<0.000000e+00> : vector<256x4xf32>
    %26 = tpu.matmul %23, %25, %cst_9 {dimension_numbers = #tpu.dot_dimension_numbers<[1], [0], [0], [1], [0, 0, 1, 1], [], []>} : vector<256x12xbf16>, vector<12x4xbf16>, vector<256x4xf32> -> vector<256x4xf32>
    %27 = arith.addf %21, %26 : vector<256x4xf32>
    %28 = vector.extract_strided_slice %14 {offsets = [2, 0, 0], sizes = [16, 16, 12], strides = [1, 1, 1]} : vector<18x16x12xbf16> to vector<16x16x12xbf16>
    %29 = vector.shape_cast %28 : vector<16x16x12xbf16> to vector<256x12xbf16>
    %c2 = arith.constant 2 : index
    %c0_10 = arith.constant 0 : index
    %c0_11 = arith.constant 0 : index
    %30 = vector.load %arg2[%c2, %c0_10, %c0_11] : memref<3x12x4xbf16, #tpu.memory_space<vmem>>, vector<1x12x4xbf16>
    %31 = vector.shape_cast %30 : vector<1x12x4xbf16> to vector<12x4xbf16>
    %cst_12 = arith.constant dense<0.000000e+00> : vector<256x4xf32>
    %32 = tpu.matmul %29, %31, %cst_12 {dimension_numbers = #tpu.dot_dimension_numbers<[1], [0], [0], [1], [0, 0, 1, 1], [], []>} : vector<256x12xbf16>, vector<12x4xbf16>, vector<256x4xf32> -> vector<256x4xf32>
    %33 = arith.addf %27, %32 : vector<256x4xf32>
    %34 = vector.shape_cast %33 : vector<256x4xf32> to vector<16x16x4xf32>
    %c0_13 = arith.constant 0 : index
    %c0_14 = arith.constant 0 : index
    %35 = vector.load %arg3[%c0_13, %c0_14] : memref<1x4xf32, #tpu.memory_space<vmem>>, vector<1x4xf32>
    %36 = vector.shape_cast %35 : vector<1x4xf32> to vector<1x1x4xf32>
    %37 = vector.broadcast %36 : vector<1x1x4xf32> to vector<16x16x4xf32>
    %38 = arith.addf %34, %37 : vector<16x16x4xf32>
    %cst_15 = arith.constant dense<0.000000e+00> : vector<4xf32>
    %39 = vector.multi_reduction <add>, %38, %cst_15 [0, 1] : vector<16x16x4xf32> to vector<4xf32>
    %40 = vector.shape_cast %39 : vector<4xf32> to vector<1x1x4xf32>
    %cst_16 = arith.constant 2.560000e+02 : f32
    %41 = vector.broadcast %cst_16 : f32 to vector<1x1x4xf32>
    %42 = arith.divf %40, %41 : vector<1x1x4xf32>
    %43 = arith.mulf %38, %38 : vector<16x16x4xf32>
    %cst_17 = arith.constant dense<0.000000e+00> : vector<4xf32>
    %44 = vector.multi_reduction <add>, %43, %cst_17 [0, 1] : vector<16x16x4xf32> to vector<4xf32>
    %45 = vector.shape_cast %44 : vector<4xf32> to vector<1x1x4xf32>
    %cst_18 = arith.constant 2.560000e+02 : f32
    %46 = vector.broadcast %cst_18 : f32 to vector<1x1x4xf32>
    %47 = arith.divf %45, %46 : vector<1x1x4xf32>
    %48 = arith.mulf %42, %42 : vector<1x1x4xf32>
    %49 = arith.subf %47, %48 : vector<1x1x4xf32>
    %50 = vector.broadcast %42 : vector<1x1x4xf32> to vector<16x16x4xf32>
    %51 = arith.subf %38, %50 : vector<16x16x4xf32>
    %cst_19 = arith.constant 9.99999974E-6 : f32
    %52 = vector.broadcast %cst_19 : f32 to vector<1x1x4xf32>
    %53 = arith.addf %49, %52 : vector<1x1x4xf32>
    %54 = math.rsqrt %53 : vector<1x1x4xf32>
    %55 = vector.broadcast %54 : vector<1x1x4xf32> to vector<16x16x4xf32>
    %56 = arith.mulf %51, %55 : vector<16x16x4xf32>
    %cst_20 = arith.constant 0.000000e+00 : f32
    %57 = vector.broadcast %cst_20 : f32 to vector<16x16x4xf32>
    %58 = arith.maximumf %56, %57 : vector<16x16x4xf32>
    %59 = vector.extract_strided_slice %58 {offsets = [1, 0, 0], sizes = [1, 16, 4], strides = [1, 1, 1]} : vector<16x16x4xf32> to vector<1x16x4xf32>
    %60 = vector.extract_strided_slice %58 {offsets = [14, 0, 0], sizes = [1, 16, 4], strides = [1, 1, 1]} : vector<16x16x4xf32> to vector<1x16x4xf32>
    %61 = tpu.concatenate %59, %58, %60 in 0 : vector<1x16x4xf32>, vector<16x16x4xf32>, vector<1x16x4xf32> -> vector<18x16x4xf32>
    %62 = vector.extract_strided_slice %61 {offsets = [0, 1, 0], sizes = [18, 1, 4], strides = [1, 1, 1]} : vector<18x16x4xf32> to vector<18x1x4xf32>
    %63 = vector.extract_strided_slice %61 {offsets = [0, 0, 0], sizes = [18, 15, 4], strides = [1, 1, 1]} : vector<18x16x4xf32> to vector<18x15x4xf32>
    %64 = tpu.concatenate %62, %63 in 1 : vector<18x1x4xf32>, vector<18x15x4xf32> -> vector<18x16x4xf32>
    %65 = vector.extract_strided_slice %61 {offsets = [0, 1, 0], sizes = [18, 15, 4], strides = [1, 1, 1]} : vector<18x16x4xf32> to vector<18x15x4xf32>
    %66 = vector.extract_strided_slice %61 {offsets = [0, 14, 0], sizes = [18, 1, 4], strides = [1, 1, 1]} : vector<18x16x4xf32> to vector<18x1x4xf32>
    %67 = tpu.concatenate %65, %66 in 1 : vector<18x15x4xf32>, vector<18x1x4xf32> -> vector<18x16x4xf32>
    %68 = arith.truncf %64 : vector<18x16x4xf32> to vector<18x16x4xbf16>
    %69 = arith.truncf %61 : vector<18x16x4xf32> to vector<18x16x4xbf16>
    %70 = arith.truncf %67 : vector<18x16x4xf32> to vector<18x16x4xbf16>
    %71 = tpu.concatenate %68, %69, %70 in 2 : vector<18x16x4xbf16>, vector<18x16x4xbf16>, vector<18x16x4xbf16> -> vector<18x16x12xbf16>
    %cst_21 = arith.constant 0.000000e+00 : f32
    %72 = vector.broadcast %cst_21 : f32 to vector<256x4xf32>
    %73 = vector.extract_strided_slice %71 {offsets = [0, 0, 0], sizes = [16, 16, 12], strides = [1, 1, 1]} : vector<18x16x12xbf16> to vector<16x16x12xbf16>
    %74 = vector.shape_cast %73 : vector<16x16x12xbf16> to vector<256x12xbf16>
    %c0_22 = arith.constant 0 : index
    %c0_23 = arith.constant 0 : index
    %c0_24 = arith.constant 0 : index
    %75 = vector.load %arg4[%c0_22, %c0_23, %c0_24] : memref<3x12x4xbf16, #tpu.memory_space<vmem>>, vector<1x12x4xbf16>
    %76 = vector.shape_cast %75 : vector<1x12x4xbf16> to vector<12x4xbf16>
    %cst_25 = arith.constant dense<0.000000e+00> : vector<256x4xf32>
    %77 = tpu.matmul %74, %76, %cst_25 {dimension_numbers = #tpu.dot_dimension_numbers<[1], [0], [0], [1], [0, 0, 1, 1], [], []>} : vector<256x12xbf16>, vector<12x4xbf16>, vector<256x4xf32> -> vector<256x4xf32>
    %78 = arith.addf %72, %77 : vector<256x4xf32>
    %79 = vector.extract_strided_slice %71 {offsets = [1, 0, 0], sizes = [16, 16, 12], strides = [1, 1, 1]} : vector<18x16x12xbf16> to vector<16x16x12xbf16>
    %80 = vector.shape_cast %79 : vector<16x16x12xbf16> to vector<256x12xbf16>
    %c1_26 = arith.constant 1 : index
    %c0_27 = arith.constant 0 : index
    %c0_28 = arith.constant 0 : index
    %81 = vector.load %arg4[%c1_26, %c0_27, %c0_28] : memref<3x12x4xbf16, #tpu.memory_space<vmem>>, vector<1x12x4xbf16>
    %82 = vector.shape_cast %81 : vector<1x12x4xbf16> to vector<12x4xbf16>
    %cst_29 = arith.constant dense<0.000000e+00> : vector<256x4xf32>
    %83 = tpu.matmul %80, %82, %cst_29 {dimension_numbers = #tpu.dot_dimension_numbers<[1], [0], [0], [1], [0, 0, 1, 1], [], []>} : vector<256x12xbf16>, vector<12x4xbf16>, vector<256x4xf32> -> vector<256x4xf32>
    %84 = arith.addf %78, %83 : vector<256x4xf32>
    %85 = vector.extract_strided_slice %71 {offsets = [2, 0, 0], sizes = [16, 16, 12], strides = [1, 1, 1]} : vector<18x16x12xbf16> to vector<16x16x12xbf16>
    %86 = vector.shape_cast %85 : vector<16x16x12xbf16> to vector<256x12xbf16>
    %c2_30 = arith.constant 2 : index
    %c0_31 = arith.constant 0 : index
    %c0_32 = arith.constant 0 : index
    %87 = vector.load %arg4[%c2_30, %c0_31, %c0_32] : memref<3x12x4xbf16, #tpu.memory_space<vmem>>, vector<1x12x4xbf16>
    %88 = vector.shape_cast %87 : vector<1x12x4xbf16> to vector<12x4xbf16>
    %cst_33 = arith.constant dense<0.000000e+00> : vector<256x4xf32>
    %89 = tpu.matmul %86, %88, %cst_33 {dimension_numbers = #tpu.dot_dimension_numbers<[1], [0], [0], [1], [0, 0, 1, 1], [], []>} : vector<256x12xbf16>, vector<12x4xbf16>, vector<256x4xf32> -> vector<256x4xf32>
    %90 = arith.addf %84, %89 : vector<256x4xf32>
    %91 = vector.shape_cast %90 : vector<256x4xf32> to vector<16x16x4xf32>
    %c0_34 = arith.constant 0 : index
    %c0_35 = arith.constant 0 : index
    %92 = vector.load %arg5[%c0_34, %c0_35] : memref<1x4xf32, #tpu.memory_space<vmem>>, vector<1x4xf32>
    %93 = vector.shape_cast %92 : vector<1x4xf32> to vector<1x1x4xf32>
    %94 = vector.broadcast %93 : vector<1x1x4xf32> to vector<16x16x4xf32>
    %95 = arith.addf %91, %94 : vector<16x16x4xf32>
    %cst_36 = arith.constant dense<0.000000e+00> : vector<4xf32>
    %96 = vector.multi_reduction <add>, %95, %cst_36 [0, 1] : vector<16x16x4xf32> to vector<4xf32>
    %97 = vector.shape_cast %96 : vector<4xf32> to vector<1x1x4xf32>
    %cst_37 = arith.constant 2.560000e+02 : f32
    %98 = vector.broadcast %cst_37 : f32 to vector<1x1x4xf32>
    %99 = arith.divf %97, %98 : vector<1x1x4xf32>
    %100 = arith.mulf %95, %95 : vector<16x16x4xf32>
    %cst_38 = arith.constant dense<0.000000e+00> : vector<4xf32>
    %101 = vector.multi_reduction <add>, %100, %cst_38 [0, 1] : vector<16x16x4xf32> to vector<4xf32>
    %102 = vector.shape_cast %101 : vector<4xf32> to vector<1x1x4xf32>
    %cst_39 = arith.constant 2.560000e+02 : f32
    %103 = vector.broadcast %cst_39 : f32 to vector<1x1x4xf32>
    %104 = arith.divf %102, %103 : vector<1x1x4xf32>
    %105 = arith.mulf %99, %99 : vector<1x1x4xf32>
    %106 = arith.subf %104, %105 : vector<1x1x4xf32>
    %107 = vector.broadcast %99 : vector<1x1x4xf32> to vector<16x16x4xf32>
    %108 = arith.subf %95, %107 : vector<16x16x4xf32>
    %cst_40 = arith.constant 9.99999974E-6 : f32
    %109 = vector.broadcast %cst_40 : f32 to vector<1x1x4xf32>
    %110 = arith.addf %106, %109 : vector<1x1x4xf32>
    %111 = math.rsqrt %110 : vector<1x1x4xf32>
    %112 = vector.broadcast %111 : vector<1x1x4xf32> to vector<16x16x4xf32>
    %113 = arith.mulf %108, %112 : vector<16x16x4xf32>
    %114 = arith.addf %1, %113 : vector<16x16x4xf32>
    %c0_41 = arith.constant 0 : index
    %c0_42 = arith.constant 0 : index
    %c0_43 = arith.constant 0 : index
    %c0_44 = arith.constant 0 : index
    %115 = vector.load %arg6[%c0_41, %c0_42, %c0_43, %c0_44] : memref<1x16x16x4xf32, #tpu.memory_space<vmem>>, vector<1x16x16x4xf32>
    %116 = vector.shape_cast %115 : vector<1x16x16x4xf32> to vector<16x16x4xf32>
    %117 = vector.shape_cast %114 : vector<16x16x4xf32> to vector<1x16x16x4xf32>
    tpu.vector_store %arg6[%c0_41, %c0_42, %c0_43, %c0_44], %117 {strides = array<i32>} : memref<1x16x16x4xf32, #tpu.memory_space<vmem>>, vector<1x16x16x4xf32>,
    return
  }
  func.func @transform_0(%arg0: i32) -> (i32, i32, i32, i32) {
    %c0_i32 = arith.constant 0 : i32
    %c0_i32_0 = arith.constant 0 : i32
    %c0_i32_1 = arith.constant 0 : i32
    %c0_i32_2 = arith.constant 0 : i32
    return %arg0, %c0_i32, %c0_i32_0, %c0_i32_1 : i32, i32, i32, i32
  }
  func.func @transform_1(%arg0: i32) -> (i32, i32, i32) {
    %c0_i32 = arith.constant 0 : i32
    %c0_i32_0 = arith.constant 0 : i32
    %c0_i32_1 = arith.constant 0 : i32
    %c0_i32_2 = arith.constant 0 : i32
    return %c0_i32, %c0_i32_0, %c0_i32_1 : i32, i32, i32
  }
  func.func @transform_2(%arg0: i32) -> (i32, i32) {
    %c0_i32 = arith.constant 0 : i32
    %c0_i32_0 = arith.constant 0 : i32
    %c0_i32_1 = arith.constant 0 : i32
    return %c0_i32, %c0_i32_0 : i32, i32
  }
  func.func @transform_3(%arg0: i32) -> (i32, i32, i32) {
    %c0_i32 = arith.constant 0 : i32
    %c0_i32_0 = arith.constant 0 : i32
    %c0_i32_1 = arith.constant 0 : i32
    %c0_i32_2 = arith.constant 0 : i32
    return %c0_i32, %c0_i32_0, %c0_i32_1 : i32, i32, i32
  }
  func.func @transform_4(%arg0: i32) -> (i32, i32) {
    %c0_i32 = arith.constant 0 : i32
    %c0_i32_0 = arith.constant 0 : i32
    %c0_i32_1 = arith.constant 0 : i32
    return %c0_i32, %c0_i32_0 : i32, i32
  }
  func.func @transform_5(%arg0: i32) -> (i32, i32, i32, i32) {
    %c0_i32 = arith.constant 0 : i32
    %c0_i32_0 = arith.constant 0 : i32
    %c0_i32_1 = arith.constant 0 : i32
    %c0_i32_2 = arith.constant 0 : i32
    return %arg0, %c0_i32, %c0_i32_0, %c0_i32_1 : i32, i32, i32, i32
  }
}

</mosaic_0001>

<bundles_post_ra>
// kernel: resnet_block.1
= control target key start
LH: loop header
LB: loop body
LE: loop exit
PB: predicated region body
PF: predicated region fallthrough
CT: control target
= control target key end

     0   :  { %s3729_s18 = smov 0   ;;  %s6040_s0 = inlined_call_operand.vmem [shape: f32[2,16,16,4], index: 0, kind: input, shape index: {}, may-alias: {0,5}]   ;;  %s6041_s1 = inlined_call_operand.vmem [shape: bf16[3,12,4], index: 1, kind: input, shape index: {}]   ;;  %s6042_s2 = inlined_call_operand.vmem [shape: f32[1,4], index: 2, kind: input, shape index: {}]   ;;  %s6043_s3 = inlined_call_operand.vmem [shape: bf16[3,12,4], index: 3, kind: input, shape index: {}]   ;;  %s6044_s4 = inlined_call_operand.vmem [shape: f32[1,4], index: 4, kind: input, shape index: {}]   ;;  %s6045_s5 = inlined_call_operand.vmem [shape: f32[2,16,16,4], index: 5, kind: output, shape index: {}, may-alias: {0,5}]  }
   0x1 LB: > { %s3092_s19 = sadd.s32 4294967295, %s3695_s18   ;;  %p3096_p0 = scmp.ge.s32.totalorder %s3695_s18, 1  ;;  %s3695_s18 = sphi %s3729_s18, %s15_s18  }
   0x2   : > { %p187_p1 = scmp.lt.s32.totalorder %s3695_s18, 3 }
   0x4   : > { %p188_p2 = pnand %p3096_p0, %p187_p1 }
   0x6   : > { %191 = sbr.rel (%p188_p2) target bundleno = 1195 (0x4ab), region = 40 }
   0xd   : > { %p215_p3 = scmp.lt.s32.totalorder %s3092_s19, 1  ;;  %vm785_vm0 = vcmask 1045504   ;;  %v3667_v0 = vld [vmem:[%s6041_s1 + $0x8] sm:$0x3f]   ;;  %v3745_v1 = vld [vmem:[%s6041_s1] sm:$0x3f]  }
   0xe   : > { %3651 = vmatprep.subr.msk.bf16.mxu0 %vm785_vm0, %v3667_v0  ;;  %v787_v2 = vsel %vm785_vm0, %v3667_v0, 0  ;;  %vm419_vm1 = vcmask 1046528   ;;  %s3697_s28 = smov 4   ;;  %s3698_s29 = smov 8   ;;  %vm322_vm2 = vcmask 1040384   ;;  %vm660_vm3 = vcmask 31744  }
   0xf   : > { %s6246_s19 = smov (!%p215_p3, %s3092_s19), 1  ;;  %3320 = vmatpush3.bf16.msra.mxu0 %v787_v2  ;;  %vm709_vm4 = vcmask 64512   ;;  %vm752_vm5 = vcmask 97280  }
  0x10   : > { %s3215_s24 = sshll.u32 %s6246_s19, 8  ;;  %3652 = vmatprep.subr.msk.bf16.mxu0 %vm785_vm0, %v3745_v1 }
  0x11   : > { %s3755_s27 = scalar_lea.vmem %s6040_s0, %s3215_s24  ;;  %s5927_s21 = scalar_lea.vmem %s6045_s5, %s3215_s24 }
  0x12   : > { %v3758_v3 = vld [vmem:[%s3755_s27] sm:$0xff]  ;;  %v3761_v4 = vld [vmem:[%s3755_s27 + $0x8] sm:$0xff]  ;;  %v3764_v5 = vld [vmem:[%s3755_s27 + $0x10] sm:$0xff] }
  0x13   : > { %v533_v6 = vpack.c.bf16 %v3761_v4, %v3758_v3  ;;  %v275_v7 = vrot.slane %v3758_v3, 1  ;;  %v327_v8 = vrot.slane %v3761_v4, 7  ;;  %v422_v9 = vrot.slane %v3761_v4, 1  ;;  %v3774_v10 = vld [vmem:[%s3755_s27 + $0x18] sm:$0xff]  ;;  %v3777_v11 = vld [vmem:[%s3755_s27 + $0x20] sm:$0xff]  ;;  %v3783_v15 = vld [vmem:[%s3755_s27 + $0x28] sm:$0xff] }
  0x14   : > { %v274_v12 = vrot.slane %v3764_v5, 1  ;;  %v324_v13 = vrot.slane %v3774_v10, 7  ;;  %v420_v14 = vrot.slane %v3774_v10, 1  ;;  %v532_v18 = vpack.c.bf16 %v3774_v10, %v3764_v5  ;;  %v3795_v19 = vld [vmem:[%s3755_s27 + $0x30] sm:$0xff]  ;;  %v3798_v20 = vld [vmem:[%s3755_s27 + $0x38] sm:$0xff]  ;;  %v3817_v32 = vld [vmem:[%s3755_s27 + $0x40] sm:$0xff] }
  0x15   : > { %582 = vrot.lane.b32.xlu0 %v533_v6, %s3697_s28  ;;  %v423_v16 = vsel %vm419_vm1, %v275_v7, %v422_v9  ;;  %v501_v17 = vsel %vm419_vm1, %v422_v9, %v327_v8  ;;  %v276_v24 = vrot.slane %v3777_v11, 1  ;;  %v330_v25 = vrot.slane %v3783_v15, 7  ;;  %v3820_v33 = vld [vmem:[%s3755_s27 + $0x48] sm:$0xff]  ;;  %v3838_v39 = vld [vmem:[%s3755_s27 + $0x50] sm:$0xff]  ;;  %v3844_v43 = vld [vmem:[%s3755_s27 + $0x58] sm:$0xff] }
  0x16   : > { %v549_v21 = vpack.c.bf16 %v501_v17, %v423_v16  ;;  %v421_v22 = vsel %vm419_vm1, %v274_v12, %v420_v14  ;;  %v500_v23 = vsel %vm419_vm1, %v420_v14, %v324_v13  ;;  %v424_v26 = vrot.slane %v3783_v15, 1  ;;  %v3848_v45 = vld [vmem:[%s3755_s27 + $0x60] sm:$0xff]  ;;  %v3851_v46 = vld [vmem:[%s3755_s27 + $0x68] sm:$0xff]  ;;  %v3863_v53 = vld [vmem:[%s3755_s27 + $0x70] sm:$0xff] }
  0x17   : > { %v548_v27 = vpack.c.bf16 %v500_v23, %v421_v22  ;;  %v277_v28 = vrot.slane %v3795_v19, 1  ;;  %v333_v29 = vrot.slane %v3798_v20, 7  ;;  %v426_v30 = vrot.slane %v3798_v20, 1  ;;  %6103 = vst [vmem:[#allocation2_spill] sm:$0xff] %v3848_v45  ;;  %6104 = vst [vmem:[#allocation3_spill] sm:$0xff] %v3851_v46  ;;  %v3866_v54 = vld [vmem:[%s3755_s27 + $0x78] sm:$0xff] }
  0x18   : > { %630 = vrot.lane.b32.xlu1 %v549_v21, %s3698_s29  ;;  %v534_v31 = vpack.c.bf16 %v3783_v15, %v3777_v11  ;;  %v425_v34 = vsel %vm419_vm1, %v276_v24, %v424_v26  ;;  %v502_v35 = vsel %vm419_vm1, %v424_v26, %v330_v25  ;;  %v535_v36 = vpack.c.bf16 %v3798_v20, %v3795_v19  ;;  %v3876_v59 = vld [vmem:[%s3755_s27 + $0x80] sm:$0xff]  ;;  %v3879_v60 = vld [vmem:[%s3755_s27 + $0x88] sm:$0xff]  ;;  %v3886_v0 = vld [vmem:[%s3755_s27 + $0x90] sm:$0xff] }
  0x19   : > { %580 = vrot.lane.b32.xlu0 %v532_v18, %s3697_s28  ;;  %v427_v37 = vsel %vm419_vm1, %v277_v28, %v426_v30  ;;  %v503_v38 = vsel %vm419_vm1, %v426_v30, %v333_v29  ;;  %v278_v40 = vrot.slane %v3817_v32, 1  ;;  %v428_v41 = vrot.slane %v3820_v33, 1  ;;  %6105 = vst [vmem:[#allocation4_spill] sm:$0xff] %v3863_v53  ;;  %6106 = vst [vmem:[#allocation5_spill] sm:$0xff] %v3866_v54  ;;  %v3889_v2 = vld [vmem:[%s3755_s27 + $0x98] sm:$0xff]  ;;  %v3909_v23 = vld [vmem:[%s3755_s27 + $0xa0] sm:$0xff] }
  0x1a   : > { %v550_v42 = vpack.c.bf16 %v502_v35, %v425_v34  ;;  %v336_v44 = vrot.slane %v3820_v33, 7  ;;  %v551_v47 = vpack.c.bf16 %v503_v38, %v427_v37  ;;  %v536_v48 = vpack.c.bf16 %v3820_v33, %v3817_v32  ;;  %6107 = vst [vmem:[#allocation6_spill] sm:$0xff] %v3876_v59  ;;  %6108 = vst [vmem:[#allocation7_spill] sm:$0xff] %v3879_v60  ;;  %v3912_v26 = vld [vmem:[%s3755_s27 + $0xa8] sm:$0xff] }
  0x1b   : > { %v429_v49 = vsel %vm419_vm1, %v278_v40, %v428_v41  ;;  %v279_v50 = vrot.slane %v3838_v39, 1  ;;  %v339_v51 = vrot.slane %v3844_v43, 7  ;;  %v430_v52 = vrot.slane %v3844_v43, 1  ;;  %6109 = vst [vmem:[#allocation8_spill] sm:$0xff] %v3886_v0  ;;  %6110 = vst [vmem:[#allocation9_spill] sm:$0xff] %v3889_v2 }
  0x1c   : > { %628 = vrot.lane.b32.xlu1 %v548_v27, %s3698_s29  ;;  %v504_v55 = vsel %vm419_vm1, %v428_v41, %v336_v44  ;;  %v280_v56 = vrot.slane %v3848_v45, 1  ;;  %v342_v57 = vrot.slane %v3851_v46, 7  ;;  %v432_v58 = vrot.slane %v3851_v46, 1  ;;  %6111 = vst [vmem:[#allocation10_spill] sm:$0xff] %v3909_v23  ;;  %6112 = vst [vmem:[#allocation11_spill] sm:$0xff] %v3912_v26  ;;  %v3928_v41 = vld [vmem:[%s3755_s27 + $0xb0] sm:$0xff] }
  0x1d   : > { %584 = vrot.lane.b32.xlu0 %v534_v31, %s3697_s28  ;;  %v537_v61 = vpack.c.bf16 %v3844_v43, %v3838_v39  ;;  %v6051_v62 = vrot.slane %v3863_v53, 1  ;;  %v434_v63 = vrot.slane %v3866_v54, 1  ;;  %v552_v6 = vpack.c.bf16 %v504_v55, %v429_v49  ;;  %6113 = vst [vmem:[#allocation12_spill] sm:$0xff] %v3928_v41 }
  0x1e   : > { %v431_v9 = vsel %vm419_vm1, %v279_v50, %v430_v52  ;;  %v505_v14 = vsel %vm419_vm1, %v430_v52, %v339_v51  ;;  %v6052_v16 = vrot.slane %v3866_v54, 7  ;;  %v433_v17 = vsel %vm419_vm1, %v280_v56, %v432_v58 }
  0x1f   : > { %v506_v18 = vsel %vm419_vm1, %v432_v58, %v342_v57  ;;  %v6046_v21 = vrot.slane %v3876_v59, 1  ;;  %v6047_v22 = vrot.slane %v3879_v60, 7  ;;  %v436_v27 = vrot.slane %v3879_v60, 1 }
  0x20   : > { %586 = vrot.lane.b32.xlu1 %v535_v36, %s3697_s28  ;;  %v6048_v30 = vrot.slane %v3886_v0, 1  ;;  %v6049_v31 = vrot.slane %v3889_v2, 7  ;;  %v438_v34 = vrot.slane %v3889_v2, 1  ;;  %v553_v35 = vpack.c.bf16 %v505_v14, %v431_v9 }
  0x21   : > { %632 = vrot.lane.b32.xlu0 %v550_v42, %s3698_s29  ;;  %v538_v36 = vpack.c.bf16 %v3851_v46, %v3848_v45  ;;  %v435_v37 = vsel %vm419_vm1, %v6051_v62, %v434_v63  ;;  %v507_v38 = vsel %vm419_vm1, %v434_v63, %v6052_v16  ;;  %v3931_v42 = vld [vmem:[%s3755_s27 + $0xb8] sm:$0xff]  ;;  %v440_v49 = vrot.slane %v3912_v26, 1 }
  0x22   : > { %6114 = vst [vmem:[#allocation13_spill] sm:$0xff] %v3931_v42  ;;  %v539_v52 = vpack.c.bf16 %v3866_v54, %v3863_v53  ;;  %v554_v55 = vpack.c.bf16 %v506_v18, %v433_v17  ;;  %v540_v58 = vpack.c.bf16 %v3879_v60, %v3876_v59  ;;  %v3946_v63 = vsel %vm419_vm1, %v6046_v21, %v436_v27 }
  0x23   : > { %v3951_v9 = vsel %vm419_vm1, %v436_v27, %v6047_v22  ;;  %v3961_v14 = vsel %vm419_vm1, %v438_v34, %v6049_v31  ;;  %v555_v17 = vpack.c.bf16 %v507_v38, %v435_v37  ;;  %v6053_v18 = vrot.slane %v3928_v41, 1  ;;  %v3967_v27 = vld [vmem:[%s3755_s27 + $0xc0] sm:$0xff]  ;;  %v3970_v22 = vld [vmem:[%s3755_s27 + $0xc8] sm:$0xff]  ;;  %v3993_v31 = vld [vmem:[%s3755_s27 + $0xd0] sm:$0xff] }
  0x24   : > { %634 = vrot.lane.b32.xlu1 %v551_v47, %s3698_s29  ;;  %v6050_v47 = vrot.slane %v3909_v23, 1  ;;  %v442_v21 = vrot.slane %v3931_v42, 1  ;;  %6115 = vst [vmem:[#allocation14_spill] sm:$0xff] %v3967_v27  ;;  %6116 = vst [vmem:[#allocation15_spill] sm:$0xff] %v3970_v22  ;;  %v6054_v16 = vrot.slane %v3993_v31, 1  ;;  %v335_v15 = vrot.slane %v3817_v32, 7 }
  0x25   : > { %588 = vrot.lane.b32.xlu0 %v536_v48, %s3697_s28  ;;  %v354_v48 = vrot.slane %v3912_v26, 7  ;;  %6117 = vst [vmem:[#allocation16_spill] sm:$0xff] %v3993_v31  ;;  %v344_v20 = vrot.slane %v3863_v53, 7 }
  0x26   : > { %v3980_v37 = vsel %vm419_vm1, %v6050_v47, %v440_v49  ;;  %v323_v47 = vrot.slane %v3764_v5, 7 }
  0x27   : > { %v3985_v38 = vsel %vm419_vm1, %v440_v49, %v354_v48  ;;  %v329_v49 = vrot.slane %v3777_v11, 7 }
  0x28   : > { %590 = vrot.lane.b32.xlu1 %v537_v61, %s3697_s28  ;;  %v357_v61 = vrot.slane %v3931_v42, 7  ;;  %v4033_v4 = vsel %vm322_vm2, %v274_v12, %v323_v47 }
  0x29   : > { %636 = vrot.lane.b32.xlu0 %v552_v6, %s3698_s29  ;;  %v3956_v6 = vsel %vm419_vm1, %v6048_v30, %v438_v34  ;;  %v326_v34 = vrot.slane %v3758_v3, 7  ;;  %v4048_v5 = vsel %vm322_vm2, %v276_v24, %v329_v49  ;;  %v338_v24 = vrot.slane %v3838_v39, 7 }
  0x2a   : > { %v4011_v30 = vsel %vm419_vm1, %v442_v21, %v357_v61  ;;  %v6133_v3 = vpack.c.bf16 %v3961_v14, %v3956_v6  ;;  %v6135_v6 = vpack.c.bf16 %v3912_v26, %v3909_v23 }
  0x2b   : > { %v4016_v62 = vsel %vm322_vm2, %v326_v34, %v327_v8  ;;  %v4087_v33 = vsel %vm322_vm2, %v338_v24, %v339_v51  ;;  %v4092_v32 = vsel %vm322_vm2, %v279_v50, %v338_v24  ;;  %v6118_v51 = vrot.slane %v3866_v54, 7 }
  0x2c   : > { %638 = vrot.lane.b32.xlu1 %v553_v35, %s3698_s29  ;;  %v556_v35 = vpack.c.bf16 %v3951_v9, %v3946_v63  ;;  %v4006_v9 = vsel %vm419_vm1, %v6053_v18, %v442_v21  ;;  %v4023_v63 = vsel %vm322_vm2, %v275_v7, %v326_v34  ;;  %v4028_v18 = vsel %vm322_vm2, %v323_v47, %v324_v13 }
  0x2d   : > { %592 = vrot.lane.b32.xlu0 %v538_v36, %s3697_s28  ;;  %v332_v36 = vrot.slane %v3795_v19, 7  ;;  %v4043_v7 = vsel %vm322_vm2, %v329_v49, %v330_v25  ;;  %v341_v25 = vrot.slane %v3848_v45, 7  ;;  %v4072_v19 = vsel %vm322_vm2, %v335_v15, %v336_v44  ;;  %v4178_v44 = vld [vmem:[%s3755_s27 + $0xf8] sm:$0xff] }
  0x2e   : > { %v350_v21 = vrot.slane %v3886_v0, 7  ;;  %v4109_v39 = vsel %vm322_vm2, %v344_v20, %v6118_v51  ;;  %v6119_v50 = vrot.slane %v3863_v53, 1  ;;  %v6123_v49 = vrot.slane %v3876_v59, 1  ;;  %6130 = vst [vmem:[#allocation21_spill] sm:$0xff] %v4178_v44 }
  0x2f   : > { %v4055_v12 = vsel %vm322_vm2, %v332_v36, %v333_v29  ;;  %v4060_v13 = vsel %vm322_vm2, %v277_v28, %v332_v36  ;;  %v4077_v28 = vsel %vm322_vm2, %v278_v40, %v335_v15  ;;  %v347_v29 = vrot.slane %v3876_v59, 7 }
  0x30   : > { %594 = vrot.lane.b32.xlu1 %v539_v52, %s3697_s28  ;;  %v4097_v40 = vsel %vm322_vm2, %v341_v25, %v342_v57  ;;  %v4104_v43 = vsel %vm322_vm2, %v280_v56, %v341_v25  ;;  %v4114_v52 = vsel %vm322_vm2, %v6119_v50, %v344_v20  ;;  %v4117_v57 = vld [vmem:[%s3755_s27 + $0xd8] sm:$0xff]  ;;  %v6124_v15 = vpack.c.bf16 %v3889_v2, %v3886_v0  ;;  %v4161_v56 = vld [vmem:[%s3755_s27 + $0xe8] sm:$0xff] }
  0x31   : > { %640 = vrot.lane.b32.xlu0 %v554_v55, %s3698_s29  ;;  %6120 = vst [vmem:[#allocation17_spill] sm:$0xff] %v4117_v57  ;;  %v4120_v55 = vld [vmem:[%s3755_s27 + $0xe0] sm:$0xff]  ;;  %v4134_v36 = vsel %vm322_vm2, %v6123_v49, %v347_v29  ;;  %v6125_v25 = vrot.slane %v3889_v2, 7  ;;  %v6126_v51 = vrot.slane %v3886_v0, 1  ;;  %v353_v50 = vrot.slane %v3909_v23, 7  ;;  %6127 = vst [vmem:[#allocation19_spill] sm:$0xff] %v4161_v56 }
  0x32   : > { %6121 = vst [vmem:[#allocation18_spill] sm:$0xff] %v4120_v55  ;;  %v356_v49 = vrot.slane %v3928_v41, 7  ;;  %v362_v24 = vrot.slane %v3993_v31, 7  ;;  %v366_v14 = vrot.slane %v4161_v56, 7  ;;  %v369_v47 = vrot.slane %v4178_v44, 7 }
  0x33   : > { %v4145_v20 = vsel %vm322_vm2, %v350_v21, %v6125_v25  ;;  %v363_v25 = vrot.slane %v4117_v57, 7 }
  0x34   : > { %642 = vrot.lane.b32.xlu1 %v555_v17, %s3698_s29  ;;  %v6122_v17 = vrot.slane %v3879_v60, 7  ;;  %v4185_v11 = vsel %vm322_vm2, %v356_v49, %v357_v61  ;;  %v6134_v61 = vrot.slane %v3967_v27, 1 }
  0x35   : > { %596 = vrot.lane.b32.xlu0 %v540_v58, %s3697_s28  ;;  %v4175_v58 = vld [vmem:[%s3755_s27 + $0xf0] sm:$0xff] }
  0x36   : > { %v4129_v34 = vsel %vm322_vm2, %v347_v29, %v6122_v17  ;;  %v4150_v29 = vsel %vm322_vm2, %v6126_v51, %v350_v21  ;;  %v288_v21 = vrot.slane %v4120_v55, 1  ;;  %v4167_v51 = vsel %vm322_vm2, %v353_v50, %v354_v48  ;;  %6129 = vst [vmem:[#allocation20_spill] sm:$0xff] %v4175_v58 }
  0x37   : > { %v6131_v48 = vrot.slane %v3928_v41, 1 }
  0x38   : > { %598 = vrot.lane.b32.xlu1 %v6124_v15, %s3697_s28  ;;  %v359_v15 = vrot.slane %v3967_v27, 7 }
  0x39   : > { %644 = vrot.lane.b32.xlu0 %v556_v35, %s3698_s29  ;;  %v6128_v35 = vrot.slane %v3909_v23, 1  ;;  %v4190_v10 = vsel %vm322_vm2, %v6131_v48, %v356_v49  ;;  %v4209_v49 = vsel %vm322_vm2, %v362_v24, %v363_v25  ;;  %v4214_v48 = vsel %vm322_vm2, %v6054_v16, %v362_v24 }
  0x3a   : > { %v4206_v8 = vsel %vm322_vm2, %v6134_v61, %v359_v15  ;;  %v444_v61 = vrot.slane %v3970_v22, 1  ;;  %v289_v24 = vrot.slane %v4175_v58, 1  ;;  %v368_v16 = vrot.slane %v4175_v58, 7 }
  0x3b   : > { %v4172_v17 = vsel %vm322_vm2, %v6128_v35, %v353_v50  ;;  %v6132_v50 = vrot.slane %v3970_v22, 7 }
  0x3c   : > { %646 = vrot.lane.b32.xlu1 %v6133_v3, %s3698_s29  ;;  %v559_v3 = vpack.c.bf16 %v4011_v30, %v4006_v9  ;;  %v4245_v2 = vsel %vm322_vm2, %v368_v16, %v369_v47  ;;  %v4248_v0 = vsel %vm322_vm2, %v289_v24, %v368_v16  ;;  %v6138_v9 = vrot.slane %v3967_v27, 1 }
  0x3d   : > { %v4195_v35 = vsel %vm322_vm2, %v359_v15, %v6132_v50  ;;  %600 = vrot.lane.b32.xlu0 %v6135_v6, %s3697_s28  ;;  %v365_v50 = vrot.slane %v4120_v55, 7  ;;  %v6136_v15 = vpack.c.bf16 %v3931_v42, %v3928_v41  ;;  %v446_v42 = vrot.slane %v4117_v57, 1 }
  0x3e   : > { %v445_v23 = vsel %vm419_vm1, %v6138_v9, %v444_v61  ;;  %v6139_v16 = vrot.slane %v3970_v22, 7  ;;  %v448_v9 = vrot.slane %v4161_v56, 1 }
  0x3f   : > { %v4231_v6 = vsel %vm322_vm2, %v365_v50, %v366_v14  ;;  %v4234_v26 = vsel %vm322_vm2, %v288_v21, %v365_v50  ;;  %v6137_v50 = vpack.c.bf16 %v3985_v38, %v3980_v37  ;;  %v545_v37 = vpack.c.bf16 %v4117_v57, %v3993_v31 }
  0x40   : > { %602 = vrot.lane.b32.xlu1 %v6136_v15, %s3697_s28  ;;  %v544_v15 = vpack.c.bf16 %v3970_v22, %v3967_v27  ;;  %v512_v41 = vsel %vm419_vm1, %v444_v61, %v6139_v16  ;;  %v513_v27 = vsel %vm419_vm1, %v446_v42, %v363_v25  ;;  %v450_v61 = vrot.slane %v4178_v44, 1 }
  0x41   : > { %648 = vrot.lane.b32.xlu0 %v6137_v50, %s3698_s29  ;;  %v560_v38 = vpack.c.bf16 %v512_v41, %v445_v23  ;;  %v6140_v50 = vrot.slane %v3993_v31, 1  ;;  %v449_v23 = vsel %vm419_vm1, %v288_v21, %v448_v9  ;;  %v514_v41 = vsel %vm419_vm1, %v448_v9, %v366_v14 }
  0x42   : > { %v562_v25 = vpack.c.bf16 %v514_v41, %v449_v23  ;;  %v6144_v41 = vpack.c.bf16 %v4055_v12, %v4060_v13  ;;  %v6146_v12 = vpack.c.bf16 %v4087_v33, %v4092_v32  ;;  %v6148_v33 = vpack.c.bf16 %v4109_v39, %v4114_v52 }
  0x43   : > { %v447_v30 = vsel %vm419_vm1, %v6140_v50, %v446_v42  ;;  %v547_v42 = vpack.c.bf16 %v4178_v44, %v4175_v58  ;;  %v6150_v39 = vpack.c.bf16 %v4145_v20, %v4150_v29  ;;  %v6152_v20 = vpack.c.bf16 %v4185_v11, %v4190_v10 }
  0x44   : > { %650 = vrot.lane.b32.xlu1 %v559_v3, %s3698_s29  ;;  %v561_v22 = vpack.c.bf16 %v513_v27, %v447_v30  ;;  %v546_v3 = vpack.c.bf16 %v4161_v56, %v4120_v55  ;;  %v451_v27 = vsel %vm419_vm1, %v289_v24, %v450_v61  ;;  %v6154_v10 = vpack.c.bf16 %v4209_v49, %v4214_v48 }
  0x45   : > { %604 = vrot.lane.b32.xlu0 %v544_v15, %s3697_s28  ;;  %v515_v15 = vsel %vm419_vm1, %v450_v61, %v369_v47  ;;  %v6156_v49 = vpack.c.bf16 %v4245_v2, %v4248_v0  ;;  %v4472_v0 = vld [vmem:[%s6042_s2] ss:$0 sm:$0xff] }
  0x46   : > { %v563_v30 = vpack.c.bf16 %v515_v15, %v451_v27  ;;  %v6145_v27 = vpack.c.bf16 %v4072_v19, %v4077_v28  ;;  %v6147_v28 = vpack.c.bf16 %v4097_v40, %v4104_v43  ;;  %v6149_v43 = vpack.c.bf16 %v4129_v34, %v4134_v36 }
  0x47   : > { %v6151_v34 = vpack.c.bf16 %v4167_v51, %v4172_v17  ;;  %v6153_v17 = vpack.c.bf16 %v4195_v35, %v4206_v8  ;;  %v6155_v8 = vpack.c.bf16 %v4231_v6, %v4234_v26 }
  0x48   : > { %606 = vrot.lane.b32.xlu1 %v545_v37, %s3697_s28  ;;  %v6142_v37 = vpack.c.bf16 %v4028_v18, %v4033_v4  ;;  %v6143_v18 = vpack.c.bf16 %v4043_v7, %v4048_v5 }
  0x49   : > { %652 = vrot.lane.b32.xlu0 %v560_v38, %s3698_s29 }
  0x4c   : > { %654 = vrot.lane.b32.xlu1 %v561_v22, %s3698_s29  ;;  %v6141_v22 = vpack.c.bf16 %v4016_v62, %v4023_v63  ;;  %v956_v62 = vsel %vm785_vm0, %v3745_v1, 0  ;;  %v4308_v63 = vld [vmem:[%s6041_s1 + $0x10] sm:$0x3f]  }
  0x4d   : > { %608 = vrot.lane.b32.xlu0 %v546_v3, %s3697_s28  ;;  %v1128_v26 = vsel %vm785_vm0, %v4308_v63, 0 }
  0x50   : > { %610 = vrot.lane.b32.xlu1 %v547_v42, %s3697_s28 }
  0x51   : > { %656 = vrot.lane.b32.xlu0 %v562_v25, %s3698_s29 }
  0x54   : > { %658 = vrot.lane.b32.xlu1 %v563_v30, %s3698_s29 }
  0x87   : > { %v583_v21 = vpop.permute.xlu0 %582 }
  0x88   : > { %v666_v14 = vsel %vm660_vm3, %v6141_v22, %v583_v21 }
  0x8a   : > { %v631_v16 = vpop.permute.xlu1 %630 }
  0x8b   : > { %v581_v24 = vpop.permute.xlu0 %580  ;;  %v4295_v47 = vsel %vm709_vm4, %v666_v14, %v631_v16 }
  0x8c   : > { %v663_v38 = vsel %vm660_vm3, %v6142_v37, %v581_v24  ;;  %3321 = vmatprep.mubr.msk.bf16.mxu0 %vm752_vm5, %v4295_v47 }
  0x8e   : > { %v629_v50 = vpop.permute.xlu1 %628 }
  0x8f   : > { %v4311_v9 = vsel %vm709_vm4, %v663_v38, %v629_v50  ;;  %v585_v3 = vpop.permute.xlu0 %584 }
  0x90   : > { %3322 = vmatmul.mubr.msk.bf16.vlgmr.msra.gmra.mrb[0].mxu0 %vm752_vm5, %v4311_v9  ;;  %v669_v4 = vsel %vm660_vm3, %v6143_v18, %v585_v3 }
  0x91   : > { %3354 = vmatpush3.bf16.msra.mxu0 %v956_v62 }
  0x92   : > { %v587_v61 = vpop.permute.xlu1 %586  ;;  %3653 = vmatprep.subr.msk.bf16.mxu0 %vm785_vm0, %v4308_v63 }
  0x93   : > { %v633_v1 = vpop.permute.xlu0 %632  ;;  %v672_v42 = vsel %vm660_vm3, %v6144_v41, %v587_v61 }
  0x94   : > { %v4322_v23 = vsel %vm709_vm4, %v669_v4, %v633_v1 }
  0x95   : > { %3325 = vmatprep.mubr.msk.bf16.mxu0 %vm752_vm5, %v4322_v23 }
  0x96   : > { %v635_v7 = vpop.permute.xlu1 %634 }
  0x97   : > { %v4331_v5 = vsel %vm709_vm4, %v672_v42, %v635_v7  ;;  %v589_v25 = vpop.permute.xlu0 %588 }
  0x98   : > { %3326 = vmatmul.mubr.msk.bf16.gmra.mrb[4].mxu0 %vm752_vm5, %v4331_v5  ;;  %v675_v15 = vsel %vm660_vm3, %v6145_v27, %v589_v25 }
  0x9a   : > { %v591_v30 = vpop.permute.xlu1 %590 }
  0x9b   : > { %v637_v21 = vpop.permute.xlu0 %636  ;;  %v678_v13 = vsel %vm660_vm3, %v6146_v12, %v591_v30 }
  0x9c   : > { %v4340_v22 = vsel %vm709_vm4, %v675_v15, %v637_v21 }
  0x9d   : > { %3329 = vmatprep.mubr.msk.bf16.mxu0 %vm752_vm5, %v4340_v22 }
  0x9e   : > { %v639_v14 = vpop.permute.xlu1 %638 }
  0x9f   : > { %v4349_v16 = vsel %vm709_vm4, %v678_v13, %v639_v14  ;;  %v593_v19 = vpop.permute.xlu0 %592 }
  0xa0   : > { %3330 = vmatmul.mubr.msk.bf16.gmra.mrb[8].mxu0 %vm752_vm5, %v4349_v16  ;;  %v681_v24 = vsel %vm660_vm3, %v6147_v28, %v593_v19 }
  0xa2   : > { %v595_v37 = vpop.permute.xlu1 %594 }
  0xa3   : > { %v641_v38 = vpop.permute.xlu0 %640  ;;  %v684_v32 = vsel %vm660_vm3, %v6148_v33, %v595_v37 }
  0xa4   : > { %v4358_v50 = vsel %vm709_vm4, %v681_v24, %v641_v38 }
  0xa5   : > { %3333 = vmatprep.mubr.msk.bf16.mxu0 %vm752_vm5, %v4358_v50 }
  0xa6   : > { %v643_v62 = vpop.permute.xlu1 %642 }
  0xa7   : > { %v4367_v3 = vsel %vm709_vm4, %v684_v32, %v643_v62  ;;  %v597_v40 = vpop.permute.xlu0 %596 }
  0xa8   : > { %3334 = vmatmul.mubr.msk.bf16.gmra.mrb[12].mxu0 %vm752_vm5, %v4367_v3  ;;  %v687_v18 = vsel %vm660_vm3, %v6149_v43, %v597_v40 }
  0xaa   : > { %v599_v4 = vpop.permute.xlu1 %598 }
  0xab   : > { %v645_v61 = vpop.permute.xlu0 %644  ;;  %v690_v52 = vsel %vm660_vm3, %v6150_v39, %v599_v4 }
  0xac   : > { %v727_v1 = vsel %vm709_vm4, %v687_v18, %v645_v61 }
  0xad   : > { %3337 = vmatprep.mubr.msk.bf16.mxu0 %vm752_vm5, %v727_v1 }
  0xae   : > { %v647_v41 = vpop.permute.xlu1 %646 }
  0xaf   : > { %v729_v42 = vsel %vm709_vm4, %v690_v52, %v647_v41  ;;  %v601_v7 = vpop.permute.xlu0 %600 }
  0xb0   : > { %3338 = vmatmul.mubr.msk.bf16.gmra.mrb[16].mxu0 %vm752_vm5, %v729_v42  ;;  %v693_v36 = vsel %vm660_vm3, %v6151_v34, %v601_v7 }
  0xb2   : > { %v603_v25 = vpop.permute.xlu1 %602 }
  0xb3   : > { %v649_v27 = vpop.permute.xlu0 %648  ;;  %v696_v29 = vsel %vm660_vm3, %v6152_v20, %v603_v25 }
  0xb4   : > { %v731_v15 = vsel %vm709_vm4, %v693_v36, %v649_v27 }
  0xb5   : > { %3341 = vmatprep.mubr.msk.bf16.mxu0 %vm752_vm5, %v731_v15 }
  0xb6   : > { %v651_v30 = vpop.permute.xlu1 %650 }
  0xb7   : > { %v733_v21 = vsel %vm709_vm4, %v696_v29, %v651_v30  ;;  %v605_v12 = vpop.permute.xlu0 %604 }
  0xb8   : > { %3342 = vmatmul.mubr.msk.bf16.gmra.mrb[20].mxu0 %vm752_vm5, %v733_v21  ;;  %v699_v51 = vsel %vm660_vm3, %v6153_v17, %v605_v12 }
  0xba   : > { %v607_v13 = vpop.permute.xlu1 %606 }
  0xbb   : > { %v653_v14 = vpop.permute.xlu0 %652  ;;  %v702_v11 = vsel %vm660_vm3, %v6154_v10, %v607_v13 }
  0xbc   : > { %v735_v19 = vsel %vm709_vm4, %v699_v51, %v653_v14 }
  0xbd   : > { %3345 = vmatprep.mubr.msk.bf16.mxu0 %vm752_vm5, %v735_v19 }
  0xbe   : > { %v655_v28 = vpop.permute.xlu1 %654 }
  0xbf   : > { %v737_v24 = vsel %vm709_vm4, %v702_v11, %v655_v28  ;;  %v609_v37 = vpop.permute.xlu0 %608 }
  0xc0   : > { %3346 = vmatmul.mubr.msk.bf16.gmra.mrb[24].mxu0 %vm752_vm5, %v737_v24  ;;  %v705_v35 = vsel %vm660_vm3, %v6155_v8, %v609_v37 }
  0xc2   : > { %v611_v38 = vpop.permute.xlu1 %610 }
  0xc3   : > { %v657_v33 = vpop.permute.xlu0 %656  ;;  %v708_v48 = vsel %vm660_vm3, %v6156_v49, %v611_v38 }
  0xc4   : > { %v739_v32 = vsel %vm709_vm4, %v705_v35, %v657_v33 }
  0xc5   : > { %3349 = vmatprep.mubr.msk.bf16.mxu0 %vm752_vm5, %v739_v32 }
  0xc6   : > { %v659_v62 = vpop.permute.xlu1 %658 }
  0xc7   : > { %v741_v40 = vsel %vm709_vm4, %v708_v48, %v659_v62 }
  0xc8   : > { %3350 = vmatmul.mubr.msk.bf16.gmra.mrb[28].mxu0 %vm752_vm5, %v741_v40 }
  0xc9   : > { %3355 = vmatprep.mubr.msk.bf16.mxu0 %vm752_vm5, %v4311_v9 }
  0xd0   : > { %3356 = vmatmul.mubr.msk.bf16.vlgmr.msra.gmra.mrb[0].mxu0 %vm752_vm5, %v4295_v47 }
  0xd1   : > { %3388 = vmatpush3.bf16.msra.mxu0 %v1128_v26  ;;  %3359 = vmatprep.mubr.msk.bf16.mxu0 %vm752_vm5, %v4311_v9 }
  0xd8   : > { %3360 = vmatmul.mubr.msk.bf16.gmra.mrb[4].mxu0 %vm752_vm5, %v4322_v23 }
  0xd9   : > { %3363 = vmatprep.mubr.msk.bf16.mxu0 %vm752_vm5, %v4331_v5 }
  0xe0   : > { %3364 = vmatmul.mubr.msk.bf16.gmra.mrb[8].mxu0 %vm752_vm5, %v4340_v22 }
  0xe1   : > { %3367 = vmatprep.mubr.msk.bf16.mxu0 %vm752_vm5, %v4349_v16 }
  0xe8   : > { %3368 = vmatmul.mubr.msk.bf16.gmra.mrb[12].mxu0 %vm752_vm5, %v4358_v50 }
  0xe9   : > { %3371 = vmatprep.mubr.msk.bf16.mxu0 %vm752_vm5, %v4367_v3 }
  0xf0   : > { %3372 = vmatmul.mubr.msk.bf16.gmra.mrb[16].mxu0 %vm752_vm5, %v727_v1 }
  0xf1   : > { %3375 = vmatprep.mubr.msk.bf16.mxu0 %vm752_vm5, %v729_v42 }
  0xf8   : > { %3376 = vmatmul.mubr.msk.bf16.gmra.mrb[20].mxu0 %vm752_vm5, %v731_v15 }
  0xf9   : > { %3379 = vmatprep.mubr.msk.bf16.mxu0 %vm752_vm5, %v733_v21 }
 0x100   : > { %3380 = vmatmul.mubr.msk.bf16.gmra.mrb[24].mxu0 %vm752_vm5, %v735_v19 }
 0x101   : > { %3383 = vmatprep.mubr.msk.bf16.mxu0 %vm752_vm5, %v737_v24 }
 0x108   : > { %3384 = vmatmul.mubr.msk.bf16.gmra.mrb[28].mxu0 %vm752_vm5, %v739_v32 }
 0x109   : > { %3389 = vmatprep.mubr.msk.bf16.mxu0 %vm752_vm5, %v4311_v9 }
 0x110   : > { %3390 = vmatmul.mubr.msk.bf16.vlgmr.msra.gmra.mrb[0].mxu0 %vm752_vm5, %v4322_v23 }
 0x111   : > { %3393 = vmatprep.mubr.msk.bf16.mxu0 %vm752_vm5, %v4331_v5 }
 0x118   : > { %3394 = vmatmul.mubr.msk.bf16.gmra.mrb[4].mxu0 %vm752_vm5, %v4340_v22 }
 0x119   : > { %3397 = vmatprep.mubr.msk.bf16.mxu0 %vm752_vm5, %v4349_v16 }
 0x120   : > { %3398 = vmatmul.mubr.msk.bf16.gmra.mrb[8].mxu0 %vm752_vm5, %v4358_v50 }
 0x121   : > { %3401 = vmatprep.mubr.msk.bf16.mxu0 %vm752_vm5, %v4367_v3 }
 0x128   : > { %3402 = vmatmul.mubr.msk.bf16.gmra.mrb[12].mxu0 %vm752_vm5, %v727_v1 }
 0x129   : > { %3405 = vmatprep.mubr.msk.bf16.mxu0 %vm752_vm5, %v729_v42 }
 0x130   : > { %3406 = vmatmul.mubr.msk.bf16.gmra.mrb[16].mxu0 %vm752_vm5, %v731_v15 }
 0x131   : > { %3409 = vmatprep.mubr.msk.bf16.mxu0 %vm752_vm5, %v733_v21 }
 0x138   : > { %3410 = vmatmul.mubr.msk.bf16.gmra.mrb[20].mxu0 %vm752_vm5, %v735_v19 }
 0x139   : > { %3413 = vmatprep.mubr.msk.bf16.mxu0 %vm752_vm5, %v737_v24 }
 0x140   : > { %3414 = vmatmul.mubr.msk.bf16.gmra.mrb[24].mxu0 %vm752_vm5, %v739_v32 }
 0x141   : > { %3417 = vmatprep.mubr.msk.bf16.mxu0 %vm752_vm5, %v741_v40 }
 0x148   : > { %3418 = vmatmul.mubr.msk.bf16.gmra.mrb[28].mxu0 %vm752_vm5, %v739_v32 }
 0x1e3   : > { %v3391_v2 = vpop.f32.mrb[0].mxu0 }
 0x1e4   : > { %v1164_v6 = vpop.f32.mrb[1].mxu0  ;;  %v4475_v47 = vadd.f32 %v3391_v2, %v4472_v0 }
 0x1e5   : > { %v4478_v63 = vadd.f32 %v4472_v0, %v1164_v6  ;;  %v3392_v9 = vpop.f32.mrb[2].mxu0 }
 0x1e6   : > { %v1167_v23 = vpop.f32.mrb[3].mxu0  ;;  %v4483_v22 = vadd.f32 %v3392_v9, %v4472_v0  ;;  %v1435_v50 = vmul.f32 %v4475_v47, %v4475_v47  ;;  %v1365_v61 = vsel %vm660_vm3, %v4475_v47, 0.0 }
 0x1e7   : > { %v1433_v5 = vmul.f32 %v4478_v63, %v4478_v63  ;;  %v4486_v16 = vadd.f32 %v4472_v0, %v1167_v23  ;;  %v1362_v3 = vsel %vm660_vm3, %v4478_v63, 0.0 }
 0x1e8   : > { %v1436_v39 = vmul.f32 %v4483_v22, %v4483_v22  ;;  %v1468_v36 = vsel %vm660_vm3, %v1435_v50, 0.0  ;;  %v1367_v25 = vsel %vm660_vm3, %v4483_v22, 0.0 }
 0x1e9   : > { %v1363_v43 = vsel %vm660_vm3, %v4486_v16, 0.0  ;;  %v1434_v18 = vmul.f32 %v4486_v16, %v4486_v16  ;;  %v1465_v1 = vsel %vm660_vm3, %v1433_v5, 0.0 }
 0x1ea   : > { %v1364_v4 = vadd.f32 %v1363_v43, %v1362_v3  ;;  %v1470_v12 = vsel %vm660_vm3, %v1436_v39, 0.0 }
 0x1eb   : > { %v1466_v52 = vsel %vm660_vm3, %v1434_v18, 0.0  ;;  %v3395_v41 = vpop.f32.mrb[4].mxu0 }
 0x1ec   : > { %v1366_v42 = vadd.f32 %v1365_v61, %v1364_v4  ;;  %v1467_v7 = vadd.f32 %v1466_v52, %v1465_v1  ;;  %v1180_v34 = vpop.f32.mrb[5].mxu0  ;;  %v4509_v29 = vadd.f32 %v3395_v41, %v4472_v0 }
 0x1ed   : > { %v4506_v27 = vadd.f32 %v4472_v0, %v1180_v34  ;;  %v3396_v15 = vpop.f32.mrb[6].mxu0 }
 0x1ee   : > { %v1469_v20 = vadd.f32 %v1468_v36, %v1467_v7  ;;  %v1368_v30 = vadd.f32 %v1367_v25, %v1366_v42  ;;  %v1183_v21 = vpop.f32.mrb[7].mxu0  ;;  %v4520_v10 = vadd.f32 %v3396_v15, %v4472_v0  ;;  %v1439_v24 = vmul.f32 %v4509_v29, %v4509_v29 }
 0x1ef   : > { %v1369_v17 = vsel %vm660_vm3, %v4506_v27, 0.0  ;;  %v1437_v51 = vmul.f32 %v4506_v27, %v4506_v27  ;;  %v4517_v13 = vadd.f32 %v4472_v0, %v1183_v21  ;;  %v1373_v38 = vsel %vm660_vm3, %v4509_v29, 0.0 }
 0x1f0   : > { %v1370_v14 = vadd.f32 %v1369_v17, %v1368_v30  ;;  %v1471_v19 = vadd.f32 %v1470_v12, %v1469_v20  ;;  %v1440_v32 = vmul.f32 %v4520_v10, %v4520_v10  ;;  %v1375_v40 = vsel %vm660_vm3, %v4520_v10, 0.0 }
 0x1f1   : > { %v1472_v11 = vsel %vm660_vm3, %v1437_v51, 0.0  ;;  %v1371_v28 = vsel %vm660_vm3, %v4517_v13, 0.0  ;;  %v1438_v35 = vmul.f32 %v4517_v13, %v4517_v13  ;;  %v1476_v9 = vsel %vm660_vm3, %v1439_v24, 0.0 }
 0x1f2   : > { %v1473_v37 = vadd.f32 %v1472_v11, %v1471_v19  ;;  %v1372_v8 = vadd.f32 %v1371_v28, %v1370_v14  ;;  %v1478_v61 = vsel %vm660_vm3, %v1440_v32, 0.0 }
 0x1f3   : > { %v3399_v33 = vpop.f32.mrb[8].mxu0  ;;  %v1474_v48 = vsel %vm660_vm3, %v1438_v35, 0.0 }
 0x1f4   : > { %v1374_v49 = vadd.f32 %v1373_v38, %v1372_v8  ;;  %v1196_v62 = vpop.f32.mrb[9].mxu0  ;;  %v1475_v26 = vadd.f32 %v1474_v48, %v1473_v37  ;;  %v4541_v23 = vadd.f32 %v3399_v33, %v4472_v0 }
 0x1f5   : > { %v4537_v2 = vadd.f32 %v4472_v0, %v1196_v62  ;;  %v3400_v6 = vpop.f32.mrb[10].mxu0 }
 0x1f6   : > { %v1376_v5 = vadd.f32 %v1375_v40, %v1374_v49  ;;  %v1199_v50 = vpop.f32.mrb[11].mxu0  ;;  %v1477_v3 = vadd.f32 %v1476_v9, %v1475_v26  ;;  %v4552_v39 = vadd.f32 %v3400_v6, %v4472_v0  ;;  %v1443_v34 = vmul.f32 %v4541_v23, %v4541_v23 }
 0x1f7   : > { %v1377_v43 = vsel %vm660_vm3, %v4537_v2, 0.0  ;;  %v1441_v18 = vmul.f32 %v4537_v2, %v4537_v2  ;;  %v4548_v4 = vadd.f32 %v4472_v0, %v1199_v50  ;;  %v1381_v25 = vsel %vm660_vm3, %v4541_v23, 0.0 }
 0x1f8   : > { %v1378_v1 = vadd.f32 %v1377_v43, %v1376_v5  ;;  %v1479_v52 = vadd.f32 %v1478_v61, %v1477_v3  ;;  %v1444_v21 = vmul.f32 %v4552_v39, %v4552_v39  ;;  %v1383_v51 = vsel %vm660_vm3, %v4552_v39, 0.0 }
 0x1f9   : > { %v1480_v41 = vsel %vm660_vm3, %v1441_v18, 0.0  ;;  %v1379_v42 = vsel %vm660_vm3, %v4548_v4, 0.0  ;;  %v1442_v7 = vmul.f32 %v4548_v4, %v4548_v4  ;;  %v1484_v28 = vsel %vm660_vm3, %v1443_v34, 0.0 }
 0x1fa   : > { %v1380_v36 = vadd.f32 %v1379_v42, %v1378_v1  ;;  %v1481_v15 = vadd.f32 %v1480_v41, %v1479_v52  ;;  %v1486_v49 = vsel %vm660_vm3, %v1444_v21, 0.0 }
 0x1fb   : > { %v1482_v20 = vsel %vm660_vm3, %v1442_v7, 0.0  ;;  %v3403_v30 = vpop.f32.mrb[12].mxu0 }
 0x1fc   : > { %v1382_v12 = vadd.f32 %v1381_v25, %v1380_v36  ;;  %v1212_v17 = vpop.f32.mrb[13].mxu0  ;;  %v1483_v14 = vadd.f32 %v1482_v20, %v1481_v15  ;;  %v4573_v24 = vadd.f32 %v3403_v30, %v4472_v0 }
 0x1fd   : > { %v4569_v19 = vadd.f32 %v4472_v0, %v1212_v17  ;;  %v3404_v11 = vpop.f32.mrb[14].mxu0 }
 0x1fe   : > { %v1384_v37 = vadd.f32 %v1383_v51, %v1382_v12  ;;  %v1215_v8 = vpop.f32.mrb[15].mxu0  ;;  %v1485_v35 = vadd.f32 %v1484_v28, %v1483_v14  ;;  %v4584_v62 = vadd.f32 %v3404_v11, %v4472_v0  ;;  %v1447_v5 = vmul.f32 %v4573_v24, %v4573_v24 }
 0x1ff   : > { %v1385_v38 = vsel %vm660_vm3, %v4569_v19, 0.0  ;;  %v1445_v33 = vmul.f32 %v4569_v19, %v4569_v19  ;;  %v4580_v32 = vadd.f32 %v4472_v0, %v1215_v8  ;;  %v1389_v3 = vsel %vm660_vm3, %v4573_v24, 0.0 }
 0x200   : > { %v1386_v48 = vadd.f32 %v1385_v38, %v1384_v37  ;;  %v1487_v40 = vadd.f32 %v1486_v49, %v1485_v35  ;;  %v1448_v1 = vmul.f32 %v4584_v62, %v4584_v62  ;;  %v1391_v42 = vsel %vm660_vm3, %v4584_v62, 0.0 }
 0x201   : > { %v1488_v26 = vsel %vm660_vm3, %v1445_v33, 0.0  ;;  %v1387_v6 = vsel %vm660_vm3, %v4580_v32, 0.0  ;;  %v1446_v9 = vmul.f32 %v4580_v32, %v4580_v32  ;;  %v1492_v25 = vsel %vm660_vm3, %v1447_v5, 0.0 }
 0x202   : > { %v1388_v50 = vadd.f32 %v1387_v6, %v1386_v48  ;;  %v1489_v43 = vadd.f32 %v1488_v26, %v1487_v40  ;;  %v1494_v14 = vsel %vm660_vm3, %v1448_v1, 0.0 }
 0x203   : > { %v1490_v18 = vsel %vm660_vm3, %v1446_v9, 0.0  ;;  %v3407_v61 = vpop.f32.mrb[16].mxu0 }
 0x204   : > { %v1390_v52 = vadd.f32 %v1389_v3, %v1388_v50  ;;  %v1228_v41 = vpop.f32.mrb[17].mxu0  ;;  %v1491_v7 = vadd.f32 %v1490_v18, %v1489_v43  ;;  %v4605_v15 = vadd.f32 %v3407_v61, %v4472_v0 }
 0x205   : > { %v4601_v34 = vadd.f32 %v4472_v0, %v1228_v41  ;;  %v3408_v36 = vpop.f32.mrb[18].mxu0 }
 0x206   : > { %v1392_v20 = vadd.f32 %v1391_v42, %v1390_v52  ;;  %v1231_v30 = vpop.f32.mrb[19].mxu0  ;;  %v1493_v21 = vadd.f32 %v1492_v25, %v1491_v7  ;;  %v4616_v28 = vadd.f32 %v3408_v36, %v4472_v0  ;;  %v1451_v33 = vmul.f32 %v4605_v15, %v4605_v15 }
 0x207   : > { %v1393_v12 = vsel %vm660_vm3, %v4601_v34, 0.0  ;;  %v1449_v17 = vmul.f32 %v4601_v34, %v4601_v34  ;;  %v4612_v51 = vadd.f32 %v4472_v0, %v1231_v30  ;;  %v1397_v48 = vsel %vm660_vm3, %v4605_v15, 0.0 }
 0x208   : > { %v1394_v11 = vadd.f32 %v1393_v12, %v1392_v20  ;;  %v1495_v37 = vadd.f32 %v1494_v14, %v1493_v21  ;;  %v1452_v9 = vmul.f32 %v4616_v28, %v4616_v28  ;;  %v1399_v3 = vsel %vm660_vm3, %v4616_v28, 0.0 }
 0x209   : > { %v1496_v8 = vsel %vm660_vm3, %v1449_v17, 0.0  ;;  %v1395_v35 = vsel %vm660_vm3, %v4612_v51, 0.0  ;;  %v1450_v38 = vmul.f32 %v4612_v51, %v4612_v51  ;;  %v1500_v1 = vsel %vm660_vm3, %v1451_v33, 0.0 }
 0x20a   : > { %v1396_v49 = vadd.f32 %v1395_v35, %v1394_v11  ;;  %v1497_v40 = vadd.f32 %v1496_v8, %v1495_v37  ;;  %v1502_v30 = vsel %vm660_vm3, %v1452_v9, 0.0 }
 0x20b   : > { %v1498_v26 = vsel %vm660_vm3, %v1450_v38, 0.0  ;;  %v3411_v6 = vpop.f32.mrb[20].mxu0 }
 0x20c   : > { %v1398_v5 = vadd.f32 %v1397_v48, %v1396_v49  ;;  %v1244_v50 = vpop.f32.mrb[21].mxu0  ;;  %v1499_v43 = vadd.f32 %v1498_v26, %v1497_v40  ;;  %v4637_v52 = vadd.f32 %v3411_v6, %v4472_v0 }
 0x20d   : > { %v4633_v18 = vadd.f32 %v4472_v0, %v1244_v50  ;;  %v3412_v61 = vpop.f32.mrb[22].mxu0 }
 0x20e   : > { %v1400_v41 = vadd.f32 %v1399_v3, %v1398_v5  ;;  %v1247_v42 = vpop.f32.mrb[23].mxu0  ;;  %v1501_v7 = vadd.f32 %v1500_v1, %v1499_v43  ;;  %v4648_v12 = vadd.f32 %v3412_v61, %v4472_v0  ;;  %v1455_v8 = vmul.f32 %v4637_v52, %v4637_v52 }
 0x20f   : > { %v1401_v36 = vsel %vm660_vm3, %v4633_v18, 0.0  ;;  %v1453_v25 = vmul.f32 %v4633_v18, %v4633_v18  ;;  %v4644_v20 = vadd.f32 %v4472_v0, %v1247_v42  ;;  %v1405_v38 = vsel %vm660_vm3, %v4637_v52, 0.0 }
 0x210   : > { %v1402_v21 = vadd.f32 %v1401_v36, %v1400_v41  ;;  %v1503_v17 = vadd.f32 %v1502_v30, %v1501_v7  ;;  %v1456_v40 = vmul.f32 %v4648_v12, %v4648_v12  ;;  %v1407_v9 = vsel %vm660_vm3, %v4648_v12, 0.0 }
 0x211   : > { %v1504_v14 = vsel %vm660_vm3, %v1453_v25, 0.0  ;;  %v1403_v11 = vsel %vm660_vm3, %v4644_v20, 0.0  ;;  %v1454_v37 = vmul.f32 %v4644_v20, %v4644_v20  ;;  %v1508_v43 = vsel %vm660_vm3, %v1455_v8, 0.0 }
 0x212   : > { %v1404_v35 = vadd.f32 %v1403_v11, %v1402_v21  ;;  %v1505_v33 = vadd.f32 %v1504_v14, %v1503_v17  ;;  %v1510_v30 = vsel %vm660_vm3, %v1456_v40, 0.0 }
 0x213   : > { %v1506_v49 = vsel %vm660_vm3, %v1454_v37, 0.0  ;;  %v3415_v48 = vpop.f32.mrb[24].mxu0 }
 0x214   : > { %v1406_v26 = vadd.f32 %v1405_v38, %v1404_v35  ;;  %v1260_v6 = vpop.f32.mrb[25].mxu0  ;;  %v1507_v5 = vadd.f32 %v1506_v49, %v1505_v33  ;;  %v4669_v61 = vadd.f32 %v3415_v48, %v4472_v0 }
 0x215   : > { %v4665_v50 = vadd.f32 %v4472_v0, %v1260_v6  ;;  %v3416_v3 = vpop.f32.mrb[26].mxu0 }
 0x216   : > { %v1408_v1 = vadd.f32 %v1407_v9, %v1406_v26  ;;  %v1263_v41 = vpop.f32.mrb[27].mxu0  ;;  %v1509_v42 = vadd.f32 %v1508_v43, %v1507_v5  ;;  %v4680_v17 = vadd.f32 %v3416_v3, %v4472_v0  ;;  %v1459_v35 = vmul.f32 %v4669_v61, %v4669_v61 }
 0x217   : > { %v1409_v7 = vsel %vm660_vm3, %v4665_v50, 0.0  ;;  %v1457_v36 = vmul.f32 %v4665_v50, %v4665_v50  ;;  %v4676_v25 = vadd.f32 %v4472_v0, %v1263_v41  ;;  %v1413_v33 = vsel %vm660_vm3, %v4669_v61, 0.0 }
 0x218   : > { %v1410_v21 = vadd.f32 %v1409_v7, %v1408_v1  ;;  %v1511_v14 = vadd.f32 %v1510_v30, %v1509_v42  ;;  %v1460_v26 = vmul.f32 %v4680_v17, %v4680_v17  ;;  %v1415_v5 = vsel %vm660_vm3, %v4680_v17, 0.0 }
 0x219   : > { %v1512_v11 = vsel %vm660_vm3, %v1457_v36, 0.0  ;;  %v1411_v37 = vsel %vm660_vm3, %v4676_v25, 0.0  ;;  %v1458_v8 = vmul.f32 %v4676_v25, %v4676_v25  ;;  %v1516_v41 = vsel %vm660_vm3, %v1459_v35, 0.0 }
 0x21a   : > { %v1412_v38 = vadd.f32 %v1411_v37, %v1410_v21  ;;  %v1513_v49 = vadd.f32 %v1512_v11, %v1511_v14  ;;  %v1518_v37 = vsel %vm660_vm3, %v1460_v26, 0.0 }
 0x21b   : > { %v1514_v48 = vsel %vm660_vm3, %v1458_v8, 0.0  ;;  %v3419_v40 = vpop.f32.mrb[28].mxu0 }
 0x21c   : > { %v1414_v6 = vadd.f32 %v1413_v33, %v1412_v38  ;;  %v1276_v9 = vpop.f32.mrb[29].mxu0  ;;  %v1515_v3 = vadd.f32 %v1514_v48, %v1513_v49  ;;  %v4701_v42 = vadd.f32 %v3419_v40, %v4472_v0 }
 0x21d   : > { %v4697_v43 = vadd.f32 %v4472_v0, %v1276_v9  ;;  %v3420_v1 = vpop.f32.mrb[30].mxu0 }
 0x21e   : > { %v1416_v7 = vadd.f32 %v1415_v5, %v1414_v6  ;;  %v1279_v36 = vpop.f32.mrb[31].mxu0  ;;  %v1517_v30 = vadd.f32 %v1516_v41, %v1515_v3  ;;  %v4712_v35 = vadd.f32 %v3420_v1, %v4472_v0  ;;  %v1463_v40 = vmul.f32 %v4701_v42, %v4701_v42 }
 0x21f   : > { %v1417_v21 = vsel %vm660_vm3, %v4697_v43, 0.0  ;;  %v1461_v14 = vmul.f32 %v4697_v43, %v4697_v43  ;;  %v4708_v11 = vadd.f32 %v4472_v0, %v1279_v36  ;;  %v1421_v26 = vsel %vm660_vm3, %v4701_v42, 0.0 }
 0x220   : > { %v1418_v8 = vadd.f32 %v1417_v21, %v1416_v7  ;;  %v1519_v38 = vadd.f32 %v1518_v37, %v1517_v30  ;;  %v1464_v5 = vmul.f32 %v4712_v35, %v4712_v35  ;;  %v1423_v1 = vsel %vm660_vm3, %v4712_v35, 0.0 }
 0x221   : > { %v1520_v33 = vsel %vm660_vm3, %v1461_v14, 0.0  ;;  %v1419_v49 = vsel %vm660_vm3, %v4708_v11, 0.0  ;;  %v1462_v48 = vmul.f32 %v4708_v11, %v4708_v11  ;;  %v1524_v7 = vsel %vm660_vm3, %v1463_v40, 0.0 }
 0x222   : > { %v1420_v6 = vadd.f32 %v1419_v49, %v1418_v8  ;;  %v1521_v9 = vadd.f32 %v1520_v33, %v1519_v38  ;;  %v1526_v21 = vsel %vm660_vm3, %v1464_v5, 0.0 }
 0x223   : > { %v1522_v0 = vsel %vm660_vm3, %v1462_v48, 0.0 }
 0x224   : > { %v1422_v3 = vadd.f32 %v1421_v26, %v1420_v6  ;;  %v1523_v41 = vadd.f32 %v1522_v0, %v1521_v9 }
 0x226   : > { %v1424_v36 = vadd.f32 %v1423_v1, %v1422_v3  ;;  %v1525_v30 = vadd.f32 %v1524_v7, %v1523_v41 }
 0x228   : > { %v1425_v14 = vrot.slane %v1424_v36, 4  ;;  %v1527_v37 = vadd.f32 %v1526_v21, %v1525_v30 }
 0x22a   : > { %v1426_v8 = vadd.f32 %v1425_v14, %v1424_v36  ;;  %v1528_v38 = vrot.slane %v1527_v37, 4 }
 0x22c   : > { %v1427_v33 = vrot.slane %v1426_v8, 2  ;;  %v1529_v49 = vadd.f32 %v1528_v38, %v1527_v37 }
 0x22e   : > { %v1428_v48 = vadd.f32 %v1427_v33, %v1426_v8  ;;  %v1530_v44 = vrot.slane %v1529_v49, 2 }
 0x230   : > { %v1429_v58 = vrot.slane %v1428_v48, 1  ;;  %v1531_v6 = vadd.f32 %v1530_v44, %v1529_v49 }
 0x232   : > { %v1430_v26 = vadd.f32 %v1429_v58, %v1428_v48  ;;  %v1532_v56 = vrot.slane %v1531_v6, 1 }
 0x234   : > { %v4730_v55 = vmul.f32 0.00390625, %v1430_v26  ;;  %v1533_v9 = vadd.f32 %v1532_v56, %v1531_v6 }
 0x236   : > { %v1535_v40 = vmul.f32 %v4730_v55, %v4730_v55  ;;  %v1566_v0 = vsub.f32 %v4708_v11, %v4730_v55  ;;  %v1534_v5 = vmul.f32 0.00390625, %v1533_v9  ;;  %v1546_v1 = vsub.f32 %v4548_v4, %v4730_v55 }
 0x237   : > { %v1549_v41 = vsub.f32 %v4569_v19, %v4730_v55  ;;  %v1550_v44 = vsub.f32 %v4580_v32, %v4730_v55  ;;  %v1551_v58 = vsub.f32 %v4573_v24, %v4730_v55  ;;  %v1552_v56 = vsub.f32 %v4584_v62, %v4730_v55 }
 0x238   : > { %v1536_v3 = vsub.f32 %v1534_v5, %v1535_v40  ;;  %v1553_v11 = vsub.f32 %v4601_v34, %v4730_v55  ;;  %v1554_v36 = vsub.f32 %v4612_v51, %v4730_v55  ;;  %v1555_v4 = vsub.f32 %v4605_v15, %v4730_v55 }
 0x239   : > { %v1556_v19 = vsub.f32 %v4616_v28, %v4730_v55  ;;  %v1557_v32 = vsub.f32 %v4633_v18, %v4730_v55  ;;  %v1558_v24 = vsub.f32 %v4644_v20, %v4730_v55  ;;  %v1559_v62 = vsub.f32 %v4637_v52, %v4730_v55 }
 0x23a   : > { %v1569_v7 = vadd.f32 1e-05, %v1536_v3  ;;  %v1560_v34 = vsub.f32 %v4648_v12, %v4730_v55  ;;  %v1561_v51 = vsub.f32 %v4665_v50, %v4730_v55  ;;  %v1562_v15 = vsub.f32 %v4676_v25, %v4730_v55 }
 0x23b   : > { %v1563_v28 = vsub.f32 %v4669_v61, %v4730_v55  ;;  %v1564_v18 = vsub.f32 %v4680_v17, %v4730_v55  ;;  %v1565_v20 = vsub.f32 %v4697_v43, %v4730_v55  ;;  %v1567_v52 = vsub.f32 %v4701_v42, %v4730_v55 }
 0x23c   : > { %3673 = vrsqrt.f32 %v1569_v7  ;;  %v1568_v12 = vsub.f32 %v4712_v35, %v4730_v55  ;;  %v1537_v50 = vsub.f32 %v4478_v63, %v4730_v55  ;;  %v1538_v25 = vsub.f32 %v4486_v16, %v4730_v55 }
 0x23d   : > { %v1539_v61 = vsub.f32 %v4475_v47, %v4730_v55  ;;  %v1540_v17 = vsub.f32 %v4483_v22, %v4730_v55  ;;  %v1541_v43 = vsub.f32 %v4506_v27, %v4730_v55  ;;  %v1542_v42 = vsub.f32 %v4517_v13, %v4730_v55 }
 0x23e   : > { %v1543_v35 = vsub.f32 %v4509_v29, %v4730_v55  ;;  %v1544_v63 = vsub.f32 %v4520_v10, %v4730_v55  ;;  %v1545_v16 = vsub.f32 %v4537_v2, %v4730_v55  ;;  %v1547_v47 = vsub.f32 %v4541_v23, %v4730_v55  ;;  %v4801_v29 = vld [vmem:[%s6043_s3 + $0x8] sm:$0x3f]  }
 0x23f   : > { %v1548_v22 = vsub.f32 %v4552_v39, %v4730_v55  ;;  %3654 = vmatprep.subr.msk.bf16.mxu1 %vm785_vm0, %v4801_v29 }
 0x246   : > { %v3674_v30 = vpop.eup %3673 }
 0x247   : > { %v1600_v27 = vmul.f32 %v3674_v30, %v1566_v0  ;;  %v1573_v21 = vmul.f32 %v3674_v30, %v1539_v61  ;;  %v1574_v14 = vmul.f32 %v3674_v30, %v1540_v17  ;;  %v1571_v13 = vmul.f32 %v3674_v30, %v1537_v50 }
 0x248   : > { %v1572_v37 = vmul.f32 %v3674_v30, %v1538_v25  ;;  %v1575_v10 = vmul.f32 %v3674_v30, %v1541_v43  ;;  %v1576_v8 = vmul.f32 %v3674_v30, %v1542_v42  ;;  %v1577_v38 = vmul.f32 %v3674_v30, %v1543_v35 }
 0x249   : > { %v4803_v2 = vmax.f32 %v1600_v27, 0.0  ;;  %v4805_v33 = vmax.f32 %v1573_v21, 0.0  ;;  %v4807_v23 = vmax.f32 %v1574_v14, 0.0  ;;  %v1578_v55 = vmul.f32 %v3674_v30, %v1544_v63 }
 0x24a   : > { %v1579_v39 = vmul.f32 %v3674_v30, %v1545_v16  ;;  %v1580_v49 = vmul.f32 %v3674_v30, %v1546_v1  ;;  %v1581_v48 = vmul.f32 %v3674_v30, %v1547_v47  ;;  %v1582_v6 = vmul.f32 %v3674_v30, %v1548_v22 }
 0x24b   : > { %v1907_v26 = vpack.c.bf16 %v4807_v23, %v4805_v33  ;;  %v1583_v9 = vmul.f32 %v3674_v30, %v1549_v41  ;;  %v1584_v40 = vmul.f32 %v3674_v30, %v1550_v44  ;;  %v1585_v0 = vmul.f32 %v3674_v30, %v1551_v58 }
 0x24c   : > { %v1586_v5 = vmul.f32 %v3674_v30, %v1552_v56  ;;  %v1587_v3 = vmul.f32 %v3674_v30, %v1553_v11  ;;  %v1588_v7 = vmul.f32 %v3674_v30, %v1554_v36  ;;  %v1589_v50 = vmul.f32 %v3674_v30, %v1555_v4 }
 0x24d   : > { %1955 = vrot.lane.b32.xlu1 %v1907_v26, %s3697_s28  ;;  %v1590_v25 = vmul.f32 %v3674_v30, %v1556_v19  ;;  %v1591_v61 = vmul.f32 %v3674_v30, %v1557_v32  ;;  %v1592_v17 = vmul.f32 %v3674_v30, %v1558_v24  ;;  %v1593_v43 = vmul.f32 %v3674_v30, %v1559_v62 }
 0x24e   : > { %v1594_v42 = vmul.f32 %v3674_v30, %v1560_v34  ;;  %v1595_v1 = vmul.f32 %v3674_v30, %v1561_v51  ;;  %v1596_v35 = vmul.f32 %v3674_v30, %v1562_v15  ;;  %v1597_v63 = vmul.f32 %v3674_v30, %v1563_v28 }
 0x24f   : > { %v1598_v16 = vmul.f32 %v3674_v30, %v1564_v18  ;;  %v1599_v47 = vmul.f32 %v3674_v30, %v1565_v20  ;;  %v1601_v22 = vmul.f32 %v3674_v30, %v1567_v52  ;;  %v1602_v41 = vmul.f32 %v3674_v30, %v1568_v12 }
 0x250   : > { %v4814_v44 = vmax.f32 %v1571_v13, 0.0  ;;  %v4816_v58 = vmax.f32 %v1572_v37, 0.0  ;;  %v4818_v56 = vmax.f32 %v1575_v10, 0.0  ;;  %v4820_v11 = vmax.f32 %v1576_v8, 0.0 }
 0x251   : > { %v4822_v36 = vmax.f32 %v1577_v38, 0.0  ;;  %v4824_v4 = vmax.f32 %v1578_v55, 0.0  ;;  %v4826_v19 = vmax.f32 %v1579_v39, 0.0  ;;  %v4828_v32 = vmax.f32 %v1580_v49, 0.0 }
 0x252   : > { %v1908_v24 = vpack.c.bf16 %v4816_v58, %v4814_v44  ;;  %v4832_v62 = vmax.f32 %v1581_v48, 0.0  ;;  %v4834_v34 = vmax.f32 %v1582_v6, 0.0  ;;  %v4836_v51 = vmax.f32 %v1583_v9, 0.0 }
 0x253   : > { %v4838_v15 = vmax.f32 %v1584_v40, 0.0  ;;  %v4840_v28 = vmax.f32 %v1585_v0, 0.0  ;;  %v4842_v18 = vmax.f32 %v1586_v5, 0.0  ;;  %v4844_v20 = vmax.f32 %v1587_v3, 0.0 }
 0x254   : > { %1957 = vrot.lane.b32.xlu0 %v1908_v24, %s3697_s28  ;;  %v4847_v52 = vmax.f32 %v1588_v7, 0.0  ;;  %v4849_v12 = vmax.f32 %v1589_v50, 0.0  ;;  %v4851_v30 = vmax.f32 %v1590_v25, 0.0  ;;  %v4853_v27 = vmax.f32 %v1591_v61, 0.0 }
 0x255   : > { %v4855_v21 = vmax.f32 %v1592_v17, 0.0  ;;  %v4857_v14 = vmax.f32 %v1593_v43, 0.0  ;;  %v4859_v13 = vmax.f32 %v1594_v42, 0.0  ;;  %v4861_v37 = vmax.f32 %v1595_v1, 0.0 }
 0x256   : > { %v4863_v10 = vmax.f32 %v1596_v35, 0.0  ;;  %v4865_v8 = vmax.f32 %v1597_v63, 0.0  ;;  %v4867_v38 = vmax.f32 %v1598_v16, 0.0  ;;  %v4869_v55 = vmax.f32 %v1599_v47, 0.0 }
 0x257   : > { %v4871_v39 = vmax.f32 %v1601_v22, 0.0  ;;  %v4873_v49 = vmax.f32 %v1602_v41, 0.0  ;;  %v6081_v48 = vrot.slane %v4805_v33, 1  ;;  %v6086_v6 = vrot.slane %v4807_v23, 7 }
 0x258   : > { %v1795_v26 = vrot.slane %v4807_v23, 1  ;;  %v6073_v9 = vrot.slane %v4814_v44, 1  ;;  %v6080_v40 = vrot.slane %v4816_v58, 7  ;;  %v1797_v0 = vrot.slane %v4816_v58, 1 }
 0x259   : > { %v1910_v5 = vpack.c.bf16 %v4824_v4, %v4822_v36  ;;  %v1909_v3 = vpack.c.bf16 %v4820_v11, %v4818_v56  ;;  %v6067_v7 = vrot.slane %v4822_v36, 1  ;;  %v6068_v50 = vrot.slane %v4824_v4, 7 }
 0x25a   : > { %v1796_v25 = vsel %vm419_vm1, %v6081_v48, %v1795_v26  ;;  %v1875_v61 = vsel %vm419_vm1, %v1795_v26, %v6086_v6  ;;  %v1798_v17 = vsel %vm419_vm1, %v6073_v9, %v1797_v0  ;;  %v1876_v43 = vsel %vm419_vm1, %v1797_v0, %v6080_v40 }
 0x25b   : > { %v1923_v42 = vpack.c.bf16 %v1875_v61, %v1796_v25  ;;  %v1924_v1 = vpack.c.bf16 %v1876_v43, %v1798_v17  ;;  %v1801_v35 = vrot.slane %v4824_v4, 1  ;;  %v6069_v63 = vrot.slane %v4818_v56, 1 }
 0x25c   : > { %v6072_v16 = vrot.slane %v4820_v11, 7  ;;  %v1799_v47 = vrot.slane %v4820_v11, 1  ;;  %v1912_v22 = vpack.c.bf16 %v4834_v34, %v4832_v62  ;;  %v1911_v41 = vpack.c.bf16 %v4828_v32, %v4826_v19 }
 0x25d   : > { %2003 = vrot.lane.b32.xlu1 %v1923_v42, %s3698_s29  ;;  %2005 = vrot.lane.b32.xlu0 %v1924_v1, %s3698_s29  ;;  %v1802_v24 = vsel %vm419_vm1, %v6067_v7, %v1801_v35  ;;  %v1878_v26 = vsel %vm419_vm1, %v1801_v35, %v6068_v50  ;;  %v6070_v0 = vrot.slane %v4832_v62, 1  ;;  %v6071_v25 = vrot.slane %v4834_v34, 7 }
 0x25e   : > { %v1926_v61 = vpack.c.bf16 %v1878_v26, %v1802_v24  ;;  %v1800_v17 = vsel %vm419_vm1, %v6069_v63, %v1799_v47  ;;  %v1877_v43 = vsel %vm419_vm1, %v1799_v47, %v6072_v16  ;;  %v1805_v42 = vrot.slane %v4834_v34, 1 }
 0x25f   : > { %v1925_v1 = vpack.c.bf16 %v1877_v43, %v1800_v17  ;;  %v6074_v7 = vrot.slane %v4826_v19, 1  ;;  %v6075_v35 = vrot.slane %v4828_v32, 7  ;;  %v1803_v50 = vrot.slane %v4828_v32, 1 }
 0x260   : > { %v1806_v24 = vsel %vm419_vm1, %v6070_v0, %v1805_v42  ;;  %v1880_v26 = vsel %vm419_vm1, %v1805_v42, %v6071_v25  ;;  %v6076_v42 = vrot.slane %v4840_v28, 1  ;;  %v6077_v16 = vrot.slane %v4842_v18, 7 }
 0x261   : > { %1961 = vrot.lane.b32.xlu1 %v1910_v5, %s3697_s28  ;;  %1959 = vrot.lane.b32.xlu0 %v1909_v3, %s3697_s28  ;;  %v1928_v43 = vpack.c.bf16 %v1880_v26, %v1806_v24  ;;  %v1804_v63 = vsel %vm419_vm1, %v6074_v7, %v1803_v50  ;;  %v1879_v0 = vsel %vm419_vm1, %v1803_v50, %v6075_v35  ;;  %v1809_v9 = vrot.slane %v4842_v18, 1 }
 0x262   : > { %v1927_v25 = vpack.c.bf16 %v1879_v0, %v1804_v63  ;;  %v6078_v5 = vrot.slane %v4836_v51, 1  ;;  %v6079_v3 = vrot.slane %v4838_v15, 7  ;;  %v1807_v24 = vrot.slane %v4838_v15, 1 }
 0x263   : > { %v4958_v50 = vsel %vm419_vm1, %v6076_v42, %v1809_v9  ;;  %v4963_v63 = vsel %vm419_vm1, %v1809_v9, %v6077_v16  ;;  %v6082_v0 = vrot.slane %v4849_v12, 1  ;;  %v6084_v35 = vrot.slane %v4851_v30, 7 }
 0x264   : > { %v4974_v42 = vsel %vm419_vm1, %v6078_v5, %v1807_v24  ;;  %v4979_v9 = vsel %vm419_vm1, %v1807_v24, %v6079_v3  ;;  %v1813_v16 = vrot.slane %v4851_v30, 1  ;;  %v6085_v26 = vrot.slane %v4847_v52, 7 }
 0x265   : > { %2009 = vrot.lane.b32.xlu1 %v1926_v61, %s3698_s29  ;;  %2007 = vrot.lane.b32.xlu0 %v1925_v1, %s3698_s29  ;;  %v6083_v1 = vrot.slane %v4844_v20, 1  ;;  %v1811_v7 = vrot.slane %v4847_v52, 1  ;;  %v6088_v3 = vrot.slane %v4859_v13, 7  ;;  %v1817_v40 = vrot.slane %v4859_v13, 1 }
 0x266   : > { %v4990_v5 = vsel %vm419_vm1, %v6082_v0, %v1813_v16  ;;  %v4995_v24 = vsel %vm419_vm1, %v1813_v16, %v6084_v35  ;;  %v6087_v16 = vrot.slane %v4857_v14, 1  ;;  %v6090_v35 = vrot.slane %v4855_v21, 7 }
 0x267   : > { %v5006_v48 = vsel %vm419_vm1, %v6083_v1, %v1811_v7  ;;  %v5011_v0 = vsel %vm419_vm1, %v1811_v7, %v6085_v26  ;;  %v6089_v1 = vrot.slane %v4853_v27, 1  ;;  %v1815_v7 = vrot.slane %v4855_v21, 1 }
 0x268   : > { %v5035_v61 = vsel %vm419_vm1, %v1817_v40, %v6088_v3  ;;  %v6091_v6 = vrot.slane %v4865_v8, 1  ;;  %v6093_v17 = vrot.slane %v4867_v38, 7  ;;  %v6094_v26 = vrot.slane %v4861_v37, 1 }
 0x269   : > { %1965 = vrot.lane.b32.xlu1 %v1912_v22, %s3697_s28  ;;  %1963 = vrot.lane.b32.xlu0 %v1911_v41, %s3697_s28  ;;  %v5030_v41 = vsel %vm419_vm1, %v6087_v16, %v1817_v40  ;;  %v5044_v22 = vsel %vm419_vm1, %v6089_v1, %v1815_v7  ;;  %v5049_v16 = vsel %vm419_vm1, %v1815_v7, %v6090_v35  ;;  %v1821_v40 = vrot.slane %v4867_v38, 1 }
 0x26a   : > { %v1819_v1 = vrot.slane %v4863_v10, 1  ;;  %v1823_v3 = vrot.slane %v4803_v2, 1  ;;  %v1699_v35 = vrot.slane %v4805_v33, 7  ;;  %v6160_v31 = vrot.slane %v4871_v39, 1 }
 0x26b   : > { %v5062_v7 = vsel %vm419_vm1, %v6091_v6, %v1821_v40  ;;  %v6157_v6 = vrot.slane %v4863_v10, 7  ;;  %v6163_v54 = vrot.slane %v4869_v55, 1  ;;  %v6164_v46 = vrot.slane %v4803_v2, 7 }
 0x26c   : > { %v5078_v47 = vsel %vm419_vm1, %v6094_v26, %v1819_v1  ;;  %v5094_v26 = vld [vmem:[%s6043_s3] sm:$0x3f]   ;;  %v6165_v45 = vrot.slane %v4807_v23, 7 }
 0x26d   : > { %2013 = vrot.lane.b32.xlu1 %v1928_v43, %s3698_s29  ;;  %2011 = vrot.lane.b32.xlu0 %v1927_v25, %s3698_s29  ;;  %v5067_v43 = vsel %vm419_vm1, %v1821_v40, %v6093_v17  ;;  %v5083_v57 = vsel %vm419_vm1, %v1819_v1, %v6157_v6  ;;  %v1825_v17 = vrot.slane %v4873_v49, 1  ;;  %v6158_v6 = vpack.c.bf16 %v4842_v18, %v4840_v28 }
 0x26e   : > { %v6159_v1 = vpack.c.bf16 %v4838_v15, %v4836_v51  ;;  %v1702_v40 = vrot.slane %v4814_v44, 7  ;;  %v5125_v53 = vsel %vm419_vm1, %v6163_v54, %v1823_v3  ;;  %v6167_v54 = vrot.slane %v4816_v58, 7 }
 0x26f   : > { %v5111_v60 = vsel %vm419_vm1, %v6160_v31, %v1825_v17  ;;  %v5130_v31 = vsel %vm419_vm1, %v1823_v3, %v6164_v46  ;;  %v6168_v46 = vrot.slane %v4814_v44, 1  ;;  %v1705_v3 = vrot.slane %v4818_v56, 7 }
 0x270   : > { %6161 = vst [vmem:[#allocation22_spill] sm:$0xff] %v5111_v60  ;;  %v5147_v60 = vsel %vm322_vm2, %v1702_v40, %v6167_v54 }
 0x271   : > { %1969 = vrot.lane.b32.xlu1 %v6158_v6, %s3697_s28  ;;  %1967 = vrot.lane.b32.xlu0 %v6159_v1, %s3697_s28  ;;  %v6162_v6 = vrot.slane %v4873_v49, 7  ;;  %v2158_v1 = vsel %vm785_vm0, %v4801_v29, 0  ;;  %v1937_v29 = vpack.c.bf16 %v5130_v31, %v5125_v53  ;;  %v5152_v23 = vsel %vm322_vm2, %v6168_v46, %v1702_v40 }
 0x272   : > { %3422 = vmatpush3.bf16.msra.mxu1 %v2158_v1  ;;  %v1714_v40 = vrot.slane %v4832_v62, 7  ;;  %v1717_v1 = vrot.slane %v4836_v51, 7  ;;  %v6173_v46 = vrot.slane %v4820_v11, 7  ;;  %v6176_v11 = vrot.slane %v4832_v62, 1 }
 0x273   : > { %v5116_v59 = vsel %vm419_vm1, %v1825_v17, %v6162_v6  ;;  %v5135_v17 = vsel %vm322_vm2, %v1699_v35, %v6165_v45  ;;  %v6166_v6 = vrot.slane %v4805_v33, 1  ;;  %3655 = vmatprep.subr.msk.bf16.mxu1 %vm785_vm0, %v5094_v26  ;;  %v6169_v45 = vpack.c.bf16 %v4963_v63, %v4958_v50 }
 0x274   : > { %v6170_v33 = vpack.c.bf16 %v4979_v9, %v4974_v42  ;;  %v1711_v50 = vrot.slane %v4826_v19, 7  ;;  %v1720_v63 = vrot.slane %v4840_v28, 7  ;;  %v6171_v42 = vrot.slane %v4824_v4, 7 }
 0x275   : > { %v5142_v25 = vsel %vm322_vm2, %v6166_v6, %v1699_v35  ;;  %2017 = vrot.lane.b32.xlu1 %v6169_v45, %s3698_s29  ;;  %v1708_v35 = vrot.slane %v4822_v36, 7  ;;  %v6172_v6 = vrot.slane %v4822_v36, 1  ;;  %v5187_v45 = vsel %vm322_vm2, %v1705_v3, %v6173_v46 }
 0x276   : > { %2015 = vrot.lane.b32.xlu0 %v6170_v33, %s3698_s29  ;;  %v1891_v58 = vpack.c.bf16 %v5135_v17, %v5142_v25  ;;  %v6174_v33 = vrot.slane %v4818_v56, 1  ;;  %v6175_v36 = vrot.slane %v4834_v34, 7  ;;  %v6177_v56 = vpack.c.bf16 %v4851_v30, %v4849_v12 }
 0x277   : > { %v5177_v9 = vsel %vm322_vm2, %v1708_v35, %v6171_v42  ;;  %v5182_v54 = vsel %vm322_vm2, %v6172_v6, %v1708_v35  ;;  %v5206_v6 = vsel %vm322_vm2, %v6176_v11, %v1714_v40  ;;  %v6179_v46 = vrot.slane %v4828_v32, 7 }
 0x278   : > { %v5192_v44 = vsel %vm322_vm2, %v6174_v33, %v1705_v3  ;;  %v1894_v4 = vpack.c.bf16 %v5177_v9, %v5182_v54  ;;  %v5201_v35 = vsel %vm322_vm2, %v1714_v40, %v6175_v36  ;;  %v6178_v3 = vpack.c.bf16 %v4847_v52, %v4844_v20 }
 0x279   : > { %v1893_v42 = vpack.c.bf16 %v5187_v45, %v5192_v44  ;;  %1973 = vrot.lane.b32.xlu1 %v6177_v56, %s3697_s28  ;;  %v5221_v62 = vsel %vm322_vm2, %v1711_v50, %v6179_v46  ;;  %v6180_v40 = vrot.slane %v4826_v19, 1  ;;  %v1726_v36 = vrot.slane %v4849_v12, 7 }
 0x27a   : > { %1971 = vrot.lane.b32.xlu0 %v6178_v3, %s3697_s28  ;;  %v6181_v56 = vrot.slane %v4842_v18, 7  ;;  %v6182_v32 = vrot.slane %v4840_v28, 1  ;;  %v6183_v19 = vrot.slane %v4838_v15, 7  ;;  %v6184_v11 = vrot.slane %v4836_v51, 1 }
 0x27b   : > { %v5226_v33 = vsel %vm322_vm2, %v6180_v40, %v1711_v50  ;;  %v1723_v51 = vrot.slane %v4844_v20, 7  ;;  %v6216_v44 = vpack.c.bf16 %v5201_v35, %v5206_v6 }
 0x27c   : > { %v5234_v3 = vsel %vm322_vm2, %v1720_v63, %v6181_v56  ;;  %v5239_v46 = vsel %vm322_vm2, %v6182_v32, %v1720_v63  ;;  %v5244_v50 = vsel %vm322_vm2, %v1717_v1, %v6183_v19  ;;  %v5251_v18 = vsel %vm322_vm2, %v6184_v11, %v1717_v1 }
 0x27d   : > { %v6185_v56 = vrot.slane %v4851_v30, 7  ;;  %v6186_v63 = vrot.slane %v4849_v12, 1  ;;  %v1732_v1 = vrot.slane %v4857_v14, 7  ;;  %v6187_v30 = vpack.c.bf16 %v4995_v24, %v4990_v5 }
 0x27e   : > { %v6188_v12 = vpack.c.bf16 %v5011_v0, %v5006_v48  ;;  %v1738_v11 = vrot.slane %v4865_v8, 7  ;;  %v6189_v19 = vrot.slane %v4847_v52, 7  ;;  %v6190_v5 = vrot.slane %v4844_v20, 1 }
 0x27f   : > { %v5256_v28 = vsel %vm322_vm2, %v1726_v36, %v6185_v56  ;;  %v5261_v15 = vsel %vm322_vm2, %v6186_v63, %v1726_v36  ;;  %2021 = vrot.lane.b32.xlu1 %v6187_v30, %s3698_s29  ;;  %v1729_v36 = vrot.slane %v4853_v27, 7  ;;  %v1735_v56 = vrot.slane %v4861_v37, 7 }
 0x280   : > { %2019 = vrot.lane.b32.xlu0 %v6188_v12, %s3698_s29  ;;  %v1744_v63 = vrot.slane %v4871_v39, 7  ;;  %v5284_v32 = vsel %vm322_vm2, %v1723_v51, %v6189_v19  ;;  %v5289_v24 = vsel %vm322_vm2, %v6190_v5, %v1723_v51  ;;  %v6191_v48 = vrot.slane %v4859_v13, 7 }
 0x281   : > { %v6192_v30 = vrot.slane %v4857_v14, 1  ;;  %v6193_v20 = vrot.slane %v4855_v21, 7  ;;  %v6194_v5 = vrot.slane %v4853_v27, 1  ;;  %v6196_v19 = vrot.slane %v4865_v8, 1 }
 0x282   : > { %v5294_v0 = vsel %vm322_vm2, %v1732_v1, %v6191_v48  ;;  %v6217_v45 = vpack.c.bf16 %v5221_v62, %v5226_v33  ;;  %v6218_v62 = vpack.c.bf16 %v5234_v3, %v5239_v46 }
 0x283   : > { %v5299_v12 = vsel %vm322_vm2, %v6192_v30, %v1732_v1  ;;  %v5308_v51 = vsel %vm322_vm2, %v1729_v36, %v6193_v20  ;;  %v5313_v48 = vsel %vm322_vm2, %v6194_v5, %v1729_v36  ;;  %v6195_v30 = vrot.slane %v4867_v38, 7 }
 0x284   : > { %v5325_v40 = vsel %vm322_vm2, %v6196_v19, %v1738_v11  ;;  %v6197_v20 = vrot.slane %v4863_v10, 7  ;;  %v6198_v36 = vpack.c.bf16 %v4859_v13, %v4857_v14  ;;  %v6199_v5 = vpack.c.bf16 %v4855_v21, %v4853_v27 }
 0x285   : > { %v5320_v52 = vsel %vm322_vm2, %v1738_v11, %v6195_v30  ;;  %v6200_v11 = vrot.slane %v4861_v37, 1  ;;  %v1741_v14 = vrot.slane %v4869_v55, 7  ;;  %v6202_v27 = vrot.slane %v4871_v39, 1 }
 0x286   : > { %v5330_v34 = vsel %vm322_vm2, %v1735_v56, %v6197_v20  ;;  %1977 = vrot.lane.b32.xlu1 %v6198_v36, %s3697_s28  ;;  %1975 = vrot.lane.b32.xlu0 %v6199_v5, %s3697_s28  ;;  %v1904_v30 = vpack.c.bf16 %v5320_v52, %v5325_v40  ;;  %v6201_v20 = vrot.slane %v4873_v49, 7 }
 0x287   : > { %v5345_v19 = vsel %vm322_vm2, %v6200_v11, %v1735_v56  ;;  %v5358_v21 = vsel %vm322_vm2, %v6202_v27, %v1744_v63  ;;  %v6203_v56 = vrot.slane %v4803_v2, 7  ;;  %v6204_v11 = vrot.slane %v4869_v55, 1 }
 0x288   : > { %v5350_v1 = vsel %vm322_vm2, %v1744_v63, %v6201_v20  ;;  %v6205_v63 = vpack.c.bf16 %v5035_v61, %v5030_v41  ;;  %v6206_v27 = vpack.c.bf16 %v5049_v16, %v5044_v22  ;;  %v6209_v61 = vpack.c.bf16 %v5067_v43, %v5062_v7  ;;  %v5433_v7 = vld [vmem:[%s6043_s3 + $0x10] sm:$0x3f]  }
 0x289   : > { %v1906_v36 = vpack.c.bf16 %v5350_v1, %v5358_v21  ;;  %v5365_v5 = vsel %vm322_vm2, %v1741_v14, %v6203_v56  ;;  %v5370_v20 = vsel %vm322_vm2, %v6204_v11, %v1741_v14  ;;  %v6207_v56 = vpack.c.bf16 %v4867_v38, %v4865_v8 }
 0x28a   : > { %v1905_v13 = vpack.c.bf16 %v5365_v5, %v5370_v20  ;;  %2025 = vrot.lane.b32.xlu1 %v6205_v63, %s3698_s29  ;;  %2023 = vrot.lane.b32.xlu0 %v6206_v27, %s3698_s29  ;;  %v6208_v14 = vpack.c.bf16 %v4863_v10, %v4861_v37  ;;  %v6210_v16 = vpack.c.bf16 %v5083_v57, %v5078_v47  ;;  %v6213_v10 = vld [vmem:[#allocation22_spill] sm:$0xff]  ;;  %v2327_v41 = vsel %vm785_vm0, %v5094_v26, 0 }
 0x28b   : > { %v6211_v8 = vpack.c.bf16 %v4873_v49, %v4871_v39  ;;  %v6212_v37 = vpack.c.bf16 %v4803_v2, %v4869_v55  ;;  %v6214_v38 = vpack.c.bf16 %v5116_v59, %v6213_v10  ;;  %v6215_v2 = vpack.c.bf16 %v5147_v60, %v5152_v23 }
 0x28c   : > { %v6221_v10 = vpack.c.bf16 %v5284_v32, %v5289_v24  ;;  %v6223_v32 = vpack.c.bf16 %v5308_v51, %v5313_v48  ;;  %v2499_v1 = vsel %vm785_vm0, %v5433_v7, 0 }
 0x28e   : > { %1981 = vrot.lane.b32.xlu1 %v6207_v56, %s3697_s28  ;;  %1979 = vrot.lane.b32.xlu0 %v6208_v14, %s3697_s28  ;;  %v6219_v56 = vpack.c.bf16 %v5244_v50, %v5251_v18  ;;  %v6220_v50 = vpack.c.bf16 %v5256_v28, %v5261_v15  ;;  %v6222_v28 = vpack.c.bf16 %v5294_v0, %v5299_v12 }
 0x28f   : > { %v6224_v12 = vpack.c.bf16 %v5330_v34, %v5345_v19 }
 0x292   : > { %2029 = vrot.lane.b32.xlu1 %v6209_v61, %s3698_s29  ;;  %2027 = vrot.lane.b32.xlu0 %v6210_v16, %s3698_s29 }
 0x296   : > { %1985 = vrot.lane.b32.xlu1 %v6211_v8, %s3697_s28  ;;  %1983 = vrot.lane.b32.xlu0 %v6212_v37, %s3697_s28 }
 0x29a   : > { %2033 = vrot.lane.b32.xlu1 %v6214_v38, %s3698_s29  ;;  %2031 = vrot.lane.b32.xlu0 %v1937_v29, %s3698_s29 }
 0x2bf   : > { %v1956_v57 = vpop.permute.xlu1 %1955 }
 0x2c0   : > { %v2037_v39 = vsel %vm660_vm3, %v1891_v58, %v1956_v57 }
 0x2c6   : > { %v1958_v47 = vpop.permute.xlu0 %1957 }
 0x2c7   : > { %v2040_v55 = vsel %vm660_vm3, %v6215_v2, %v1958_v47 }
 0x2cf   : > { %v2004_v49 = vpop.permute.xlu1 %2003  ;;  %v2006_v59 = vpop.permute.xlu0 %2005 }
 0x2d0   : > { %v5423_v22 = vsel %vm709_vm4, %v2037_v39, %v2004_v49  ;;  %v5426_v53 = vsel %vm709_vm4, %v2040_v55, %v2006_v59 }
 0x2d1   : > { %3423 = vmatprep.mubr.msk.bf16.mxu1 %vm752_vm5, %v5426_v53 }
 0x2d2   : > { %3424 = vmatmul.mubr.msk.bf16.vlgmr.msra.gmra.mrb[0].mxu1 %vm752_vm5, %v5423_v22 }
 0x2d3   : > { %3456 = vmatpush3.bf16.msra.mxu1 %v2327_v41  ;;  %v1962_v60 = vpop.permute.xlu1 %1961  ;;  %v1960_v43 = vpop.permute.xlu0 %1959 }
 0x2d4   : > { %3656 = vmatprep.subr.msk.bf16.mxu1 %vm785_vm0, %v5433_v7  ;;  %v2046_v26 = vsel %vm660_vm3, %v1894_v4, %v1962_v60  ;;  %v2043_v25 = vsel %vm660_vm3, %v1893_v42, %v1960_v43 }
 0x2d7   : > { %v2010_v31 = vpop.permute.xlu1 %2009  ;;  %v2008_v17 = vpop.permute.xlu0 %2007 }
 0x2d8   : > { %v5450_v29 = vsel %vm709_vm4, %v2046_v26, %v2010_v31  ;;  %v5453_v23 = vsel %vm709_vm4, %v2043_v25, %v2008_v17 }
 0x2d9   : > { %3427 = vmatprep.mubr.msk.bf16.mxu1 %vm752_vm5, %v5453_v23 }
 0x2da   : > { %3428 = vmatmul.mubr.msk.bf16.gmra.mrb[4].mxu1 %vm752_vm5, %v5450_v29 }
 0x2db   : > { %v1966_v58 = vpop.permute.xlu1 %1965  ;;  %v1964_v9 = vpop.permute.xlu0 %1963 }
 0x2dc   : > { %v2052_v54 = vsel %vm660_vm3, %v6216_v44, %v1966_v58  ;;  %v2049_v4 = vsel %vm660_vm3, %v6217_v45, %v1964_v9 }
 0x2df   : > { %v2014_v42 = vpop.permute.xlu1 %2013  ;;  %v2012_v11 = vpop.permute.xlu0 %2011 }
 0x2e0   : > { %v5468_v63 = vsel %vm709_vm4, %v2052_v54, %v2014_v42  ;;  %v5471_v27 = vsel %vm709_vm4, %v2049_v4, %v2012_v11 }
 0x2e1   : > { %3431 = vmatprep.mubr.msk.bf16.mxu1 %vm752_vm5, %v5471_v27 }
 0x2e2   : > { %3432 = vmatmul.mubr.msk.bf16.gmra.mrb[8].mxu1 %vm752_vm5, %v5468_v63 }
 0x2e3   : > { %v1970_v35 = vpop.permute.xlu1 %1969  ;;  %v1968_v6 = vpop.permute.xlu0 %1967 }
 0x2e4   : > { %v2058_v33 = vsel %vm660_vm3, %v6218_v62, %v1970_v35  ;;  %v2055_v14 = vsel %vm660_vm3, %v6219_v56, %v1968_v6 }
 0x2e7   : > { %v2018_v61 = vpop.permute.xlu1 %2017 }
 0x2e8   : > { %v2016_v16 = vpop.permute.xlu0 %2015  ;;  %v5486_v8 = vsel %vm709_vm4, %v2058_v33, %v2018_v61 }
 0x2e9   : > { %v5489_v37 = vsel %vm709_vm4, %v2055_v14, %v2016_v16 }
 0x2ea   : > { %3435 = vmatprep.mubr.msk.bf16.mxu1 %vm752_vm5, %v5489_v37 }
 0x2eb   : > { %3436 = vmatmul.mubr.msk.bf16.gmra.mrb[12].mxu1 %vm752_vm5, %v5486_v8  ;;  %v1974_v3 = vpop.permute.xlu1 %1973 }
 0x2ec   : > { %v1972_v46 = vpop.permute.xlu0 %1971  ;;  %v2064_v18 = vsel %vm660_vm3, %v6220_v50, %v1974_v3 }
 0x2ed   : > { %v2061_v38 = vsel %vm660_vm3, %v6221_v10, %v1972_v46 }
 0x2f1   : > { %v2022_v57 = vpop.permute.xlu1 %2021 }
 0x2f2   : > { %v2020_v47 = vpop.permute.xlu0 %2019  ;;  %v2102_v39 = vsel %vm709_vm4, %v2064_v18, %v2022_v57 }
 0x2f3   : > { %v2100_v2 = vsel %vm709_vm4, %v2061_v38, %v2020_v47 }
 0x2f4   : > { %3439 = vmatprep.mubr.msk.bf16.mxu1 %vm752_vm5, %v2100_v2 }
 0x2f5   : > { %3440 = vmatmul.mubr.msk.bf16.gmra.mrb[16].mxu1 %vm752_vm5, %v2102_v39 }
 0x2f8   : > { %v1978_v55 = vpop.permute.xlu1 %1977  ;;  %v1976_v49 = vpop.permute.xlu0 %1975 }
 0x2f9   : > { %v2070_v15 = vsel %vm660_vm3, %v6222_v28, %v1978_v55  ;;  %v2067_v24 = vsel %vm660_vm3, %v6223_v32, %v1976_v49 }
 0x2fc   : > { %v2026_v59 = vpop.permute.xlu1 %2025  ;;  %v2024_v41 = vpop.permute.xlu0 %2023 }
 0x2fd   : > { %v2106_v60 = vsel %vm709_vm4, %v2070_v15, %v2026_v59  ;;  %v2104_v43 = vsel %vm709_vm4, %v2067_v24, %v2024_v41 }
 0x2fe   : > { %3443 = vmatprep.mubr.msk.bf16.mxu1 %vm752_vm5, %v2104_v43 }
 0x2ff   : > { %3444 = vmatmul.mubr.msk.bf16.gmra.mrb[20].mxu1 %vm752_vm5, %v2106_v60 }
 0x300   : > { %v1982_v26 = vpop.permute.xlu1 %1981  ;;  %v1980_v25 = vpop.permute.xlu0 %1979 }
 0x301   : > { %v2076_v0 = vsel %vm660_vm3, %v1904_v30, %v1982_v26  ;;  %v2073_v51 = vsel %vm660_vm3, %v6224_v12, %v1980_v25 }
 0x304   : > { %v2030_v48 = vpop.permute.xlu1 %2029  ;;  %v2028_v31 = vpop.permute.xlu0 %2027 }
 0x305   : > { %v2110_v17 = vsel %vm709_vm4, %v2076_v0, %v2030_v48  ;;  %v2108_v58 = vsel %vm709_vm4, %v2073_v51, %v2028_v31 }
 0x306   : > { %3447 = vmatprep.mubr.msk.bf16.mxu1 %vm752_vm5, %v2108_v58 }
 0x307   : > { %3448 = vmatmul.mubr.msk.bf16.gmra.mrb[24].mxu1 %vm752_vm5, %v2110_v17 }
 0x308   : > { %v1986_v9 = vpop.permute.xlu1 %1985  ;;  %v1984_v44 = vpop.permute.xlu0 %1983 }
 0x309   : > { %v2082_v40 = vsel %vm660_vm3, %v1906_v36, %v1986_v9  ;;  %v2079_v34 = vsel %vm660_vm3, %v1905_v13, %v1984_v44  ;;  %v5596_v13 = vld [vmem:[%s6044_s4] ss:$0 sm:$0xff] }
 0x30c   : > { %v2034_v52 = vpop.permute.xlu1 %2033  ;;  %v2032_v30 = vpop.permute.xlu0 %2031 }
 0x30d   : > { %v2114_v19 = vsel %vm709_vm4, %v2082_v40, %v2034_v52  ;;  %v2112_v54 = vsel %vm709_vm4, %v2079_v34, %v2032_v30 }
 0x30e   : > { %3451 = vmatprep.mubr.msk.bf16.mxu1 %vm752_vm5, %v2112_v54 }
 0x30f   : > { %3452 = vmatmul.mubr.msk.bf16.gmra.mrb[28].mxu1 %vm752_vm5, %v2114_v19 }
 0x310   : > { %3457 = vmatprep.mubr.msk.bf16.mxu1 %vm752_vm5, %v5423_v22 }
 0x317   : > { %3458 = vmatmul.mubr.msk.bf16.vlgmr.msra.gmra.mrb[0].mxu1 %vm752_vm5, %v5426_v53 }
 0x318   : > { %3490 = vmatpush3.bf16.msra.mxu1 %v2499_v1  ;;  %3461 = vmatprep.mubr.msk.bf16.mxu1 %vm752_vm5, %v5423_v22 }
 0x31f   : > { %3462 = vmatmul.mubr.msk.bf16.gmra.mrb[4].mxu1 %vm752_vm5, %v5453_v23 }
 0x320   : > { %3465 = vmatprep.mubr.msk.bf16.mxu1 %vm752_vm5, %v5450_v29 }
 0x327   : > { %3466 = vmatmul.mubr.msk.bf16.gmra.mrb[8].mxu1 %vm752_vm5, %v5471_v27 }
 0x328   : > { %3469 = vmatprep.mubr.msk.bf16.mxu1 %vm752_vm5, %v5468_v63 }
 0x32f   : > { %3470 = vmatmul.mubr.msk.bf16.gmra.mrb[12].mxu1 %vm752_vm5, %v5489_v37 }
 0x330   : > { %3473 = vmatprep.mubr.msk.bf16.mxu1 %vm752_vm5, %v5486_v8 }
 0x337   : > { %3474 = vmatmul.mubr.msk.bf16.gmra.mrb[16].mxu1 %vm752_vm5, %v2100_v2 }
 0x338   : > { %3477 = vmatprep.mubr.msk.bf16.mxu1 %vm752_vm5, %v2102_v39 }
 0x33f   : > { %3478 = vmatmul.mubr.msk.bf16.gmra.mrb[20].mxu1 %vm752_vm5, %v2104_v43 }
 0x340   : > { %3481 = vmatprep.mubr.msk.bf16.mxu1 %vm752_vm5, %v2106_v60 }
 0x347   : > { %3482 = vmatmul.mubr.msk.bf16.gmra.mrb[24].mxu1 %vm752_vm5, %v2108_v58 }
 0x348   : > { %3485 = vmatprep.mubr.msk.bf16.mxu1 %vm752_vm5, %v2110_v17 }
 0x34f   : > { %3486 = vmatmul.mubr.msk.bf16.gmra.mrb[28].mxu1 %vm752_vm5, %v2112_v54 }
 0x350   : > { %3491 = vmatprep.mubr.msk.bf16.mxu1 %vm752_vm5, %v5423_v22 }
 0x357   : > { %3492 = vmatmul.mubr.msk.bf16.vlgmr.msra.gmra.mrb[0].mxu1 %vm752_vm5, %v5453_v23 }
 0x358   : > { %3495 = vmatprep.mubr.msk.bf16.mxu1 %vm752_vm5, %v5450_v29 }
 0x35f   : > { %3496 = vmatmul.mubr.msk.bf16.gmra.mrb[4].mxu1 %vm752_vm5, %v5471_v27 }
 0x360   : > { %3499 = vmatprep.mubr.msk.bf16.mxu1 %vm752_vm5, %v5468_v63 }
 0x367   : > { %3500 = vmatmul.mubr.msk.bf16.gmra.mrb[8].mxu1 %vm752_vm5, %v5489_v37 }
 0x368   : > { %3503 = vmatprep.mubr.msk.bf16.mxu1 %vm752_vm5, %v5486_v8 }
 0x36f   : > { %3504 = vmatmul.mubr.msk.bf16.gmra.mrb[12].mxu1 %vm752_vm5, %v2100_v2 }
 0x370   : > { %3507 = vmatprep.mubr.msk.bf16.mxu1 %vm752_vm5, %v2102_v39 }
 0x377   : > { %3508 = vmatmul.mubr.msk.bf16.gmra.mrb[16].mxu1 %vm752_vm5, %v2104_v43 }
 0x378   : > { %3511 = vmatprep.mubr.msk.bf16.mxu1 %vm752_vm5, %v2106_v60 }
 0x37f   : > { %3512 = vmatmul.mubr.msk.bf16.gmra.mrb[20].mxu1 %vm752_vm5, %v2108_v58 }
 0x380   : > { %3515 = vmatprep.mubr.msk.bf16.mxu1 %vm752_vm5, %v2110_v17 }
 0x387   : > { %3516 = vmatmul.mubr.msk.bf16.gmra.mrb[24].mxu1 %vm752_vm5, %v2112_v54 }
 0x388   : > { %3519 = vmatprep.mubr.msk.bf16.mxu1 %vm752_vm5, %v2114_v19 }
 0x38f   : > { %3520 = vmatmul.mubr.msk.bf16.gmra.mrb[28].mxu1 %vm752_vm5, %v2112_v54 }
 0x42a   : > { %v3493_v21 = vpop.f32.mrb[0].mxu1 }
 0x42b   : > { %v2535_v36 = vpop.f32.mrb[1].mxu1  ;;  %v5599_v5 = vadd.f32 %v3493_v21, %v5596_v13 }
 0x42c   : > { %v5602_v20 = vadd.f32 %v5596_v13, %v2535_v36  ;;  %v3494_v22 = vpop.f32.mrb[2].mxu1 }
 0x42d   : > { %v2538_v53 = vpop.f32.mrb[3].mxu1  ;;  %v5607_v29 = vadd.f32 %v3494_v22, %v5596_v13  ;;  %v2805_v45 = vmul.f32 %v5599_v5, %v5599_v5  ;;  %v2736_v27 = vsel %vm660_vm3, %v5599_v5, 0.0 }
 0x42e   : > { %v2803_v7 = vmul.f32 %v5602_v20, %v5602_v20  ;;  %v5610_v23 = vadd.f32 %v5596_v13, %v2538_v53  ;;  %v2733_v4 = vsel %vm660_vm3, %v5602_v20, 0.0 }
 0x42f   : > { %v2806_v6 = vmul.f32 %v5607_v29, %v5607_v29  ;;  %v2838_v16 = vsel %vm660_vm3, %v2805_v45, 0.0  ;;  %v2738_v8 = vsel %vm660_vm3, %v5607_v29, 0.0 }
 0x430   : > { %v2734_v42 = vsel %vm660_vm3, %v5610_v23, 0.0  ;;  %v2804_v11 = vmul.f32 %v5610_v23, %v5610_v23  ;;  %v2835_v35 = vsel %vm660_vm3, %v2803_v7, 0.0 }
 0x431   : > { %v2735_v63 = vadd.f32 %v2734_v42, %v2733_v4  ;;  %v2840_v38 = vsel %vm660_vm3, %v2806_v6, 0.0 }
 0x432   : > { %v2836_v62 = vsel %vm660_vm3, %v2804_v11, 0.0  ;;  %v3497_v33 = vpop.f32.mrb[4].mxu1 }
 0x433   : > { %v2737_v56 = vadd.f32 %v2736_v27, %v2735_v63  ;;  %v2837_v14 = vadd.f32 %v2836_v62, %v2835_v35  ;;  %v2551_v61 = vpop.f32.mrb[5].mxu1  ;;  %v5633_v50 = vadd.f32 %v3497_v33, %v5596_v13 }
 0x434   : > { %v5630_v37 = vadd.f32 %v5596_v13, %v2551_v61  ;;  %v3498_v3 = vpop.f32.mrb[6].mxu1 }
 0x435   : > { %v2839_v46 = vadd.f32 %v2838_v16, %v2837_v14  ;;  %v2739_v18 = vadd.f32 %v2738_v8, %v2737_v56  ;;  %v2554_v10 = vpop.f32.mrb[7].mxu1  ;;  %v5644_v49 = vadd.f32 %v3498_v3, %v5596_v13  ;;  %v2809_v32 = vmul.f32 %v5633_v50, %v5633_v50 }
 0x436   : > { %v2740_v57 = vsel %vm660_vm3, %v5630_v37, 0.0  ;;  %v2807_v47 = vmul.f32 %v5630_v37, %v5630_v37  ;;  %v5641_v39 = vadd.f32 %v5596_v13, %v2554_v10  ;;  %v2744_v60 = vsel %vm660_vm3, %v5633_v50, 0.0 }
 0x437   : > { %v2741_v2 = vadd.f32 %v2740_v57, %v2739_v18  ;;  %v2841_v55 = vadd.f32 %v2840_v38, %v2839_v46  ;;  %v2810_v26 = vmul.f32 %v5644_v49, %v5644_v49  ;;  %v2746_v51 = vsel %vm660_vm3, %v5644_v49, 0.0 }
 0x438   : > { %v2842_v28 = vsel %vm660_vm3, %v2807_v47, 0.0  ;;  %v2742_v15 = vsel %vm660_vm3, %v5641_v39, 0.0  ;;  %v2808_v41 = vmul.f32 %v5641_v39, %v5641_v39  ;;  %v2846_v58 = vsel %vm660_vm3, %v2809_v32, 0.0 }
 0x439   : > { %v2843_v24 = vadd.f32 %v2842_v28, %v2841_v55  ;;  %v2743_v59 = vadd.f32 %v2742_v15, %v2741_v2  ;;  %v2848_v54 = vsel %vm660_vm3, %v2810_v26, 0.0 }
 0x43a   : > { %v3501_v43 = vpop.f32.mrb[8].mxu1  ;;  %v2844_v0 = vsel %vm660_vm3, %v2808_v41, 0.0 }
 0x43b   : > { %v2745_v25 = vadd.f32 %v2744_v60, %v2743_v59  ;;  %v2567_v12 = vpop.f32.mrb[9].mxu1  ;;  %v2845_v48 = vadd.f32 %v2844_v0, %v2843_v24  ;;  %v5665_v9 = vadd.f32 %v3501_v43, %v5596_v13 }
 0x43c   : > { %v5661_v31 = vadd.f32 %v5596_v13, %v2567_v12  ;;  %v3502_v17 = vpop.f32.mrb[10].mxu1 }
 0x43d   : > { %v2747_v44 = vadd.f32 %v2746_v51, %v2745_v25  ;;  %v2570_v40 = vpop.f32.mrb[11].mxu1  ;;  %v2847_v34 = vadd.f32 %v2846_v58, %v2845_v48  ;;  %v5676_v21 = vadd.f32 %v3502_v17, %v5596_v13  ;;  %v2813_v45 = vmul.f32 %v5665_v9, %v5665_v9 }
 0x43e   : > { %v2748_v52 = vsel %vm660_vm3, %v5661_v31, 0.0  ;;  %v2811_v30 = vmul.f32 %v5661_v31, %v5661_v31  ;;  %v5672_v19 = vadd.f32 %v5596_v13, %v2570_v40  ;;  %v2752_v42 = vsel %vm660_vm3, %v5665_v9, 0.0 }
 0x43f   : > { %v2749_v1 = vadd.f32 %v2748_v52, %v2747_v44  ;;  %v2849_v36 = vadd.f32 %v2848_v54, %v2847_v34  ;;  %v2814_v35 = vmul.f32 %v5676_v21, %v5676_v21  ;;  %v2754_v33 = vsel %vm660_vm3, %v5676_v21, 0.0 }
 0x440   : > { %v2850_v22 = vsel %vm660_vm3, %v2811_v30, 0.0  ;;  %v2750_v53 = vsel %vm660_vm3, %v5672_v19, 0.0  ;;  %v2812_v7 = vmul.f32 %v5672_v19, %v5672_v19  ;;  %v2854_v16 = vsel %vm660_vm3, %v2813_v45, 0.0 }
 0x441   : > { %v2751_v4 = vadd.f32 %v2750_v53, %v2749_v1  ;;  %v2851_v11 = vadd.f32 %v2850_v22, %v2849_v36  ;;  %v2856_v47 = vsel %vm660_vm3, %v2814_v35, 0.0 }
 0x442   : > { %v2852_v63 = vsel %vm660_vm3, %v2812_v7, 0.0  ;;  %v3505_v27 = vpop.f32.mrb[12].mxu1 }
 0x443   : > { %v2753_v6 = vadd.f32 %v2752_v42, %v2751_v4  ;;  %v2583_v62 = vpop.f32.mrb[13].mxu1  ;;  %v2853_v56 = vadd.f32 %v2852_v63, %v2851_v11  ;;  %v5697_v8 = vadd.f32 %v3505_v27, %v5596_v13 }
 0x444   : > { %v5693_v14 = vadd.f32 %v5596_v13, %v2583_v62  ;;  %v3506_v61 = vpop.f32.mrb[14].mxu1 }
 0x445   : > { %v2755_v3 = vadd.f32 %v2754_v33, %v2753_v6  ;;  %v2586_v46 = vpop.f32.mrb[15].mxu1  ;;  %v2855_v18 = vadd.f32 %v2854_v16, %v2853_v56  ;;  %v5708_v55 = vadd.f32 %v3506_v61, %v5596_v13  ;;  %v2817_v59 = vmul.f32 %v5697_v8, %v5697_v8 }
 0x446   : > { %v2756_v10 = vsel %vm660_vm3, %v5693_v14, 0.0  ;;  %v2815_v38 = vmul.f32 %v5693_v14, %v5693_v14  ;;  %v5704_v57 = vadd.f32 %v5596_v13, %v2586_v46  ;;  %v2760_v60 = vsel %vm660_vm3, %v5697_v8, 0.0 }
 0x447   : > { %v2757_v2 = vadd.f32 %v2756_v10, %v2755_v3  ;;  %v2857_v28 = vadd.f32 %v2856_v47, %v2855_v18  ;;  %v2818_v0 = vmul.f32 %v5708_v55, %v5708_v55  ;;  %v2762_v48 = vsel %vm660_vm3, %v5708_v55, 0.0 }
 0x448   : > { %v2858_v15 = vsel %vm660_vm3, %v2815_v38, 0.0  ;;  %v2758_v32 = vsel %vm660_vm3, %v5704_v57, 0.0  ;;  %v2816_v24 = vmul.f32 %v5704_v57, %v5704_v57  ;;  %v2862_v40 = vsel %vm660_vm3, %v2817_v59, 0.0 }
 0x449   : > { %v2759_v41 = vadd.f32 %v2758_v32, %v2757_v2  ;;  %v2859_v43 = vadd.f32 %v2858_v15, %v2857_v28  ;;  %v2864_v53 = vsel %vm660_vm3, %v2818_v0, 0.0 }
 0x44a   : > { %v2860_v26 = vsel %vm660_vm3, %v2816_v24, 0.0  ;;  %v3509_v25 = vpop.f32.mrb[16].mxu1 }
 0x44b   : > { %v2761_v12 = vadd.f32 %v2760_v60, %v2759_v41  ;;  %v2599_v51 = vpop.f32.mrb[17].mxu1  ;;  %v2861_v17 = vadd.f32 %v2860_v26, %v2859_v43  ;;  %v5729_v34 = vadd.f32 %v3509_v25, %v5596_v13 }
 0x44c   : > { %v5725_v58 = vadd.f32 %v5596_v13, %v2599_v51  ;;  %v3510_v44 = vpop.f32.mrb[18].mxu1 }
 0x44d   : > { %v2763_v52 = vadd.f32 %v2762_v48, %v2761_v12  ;;  %v2602_v30 = vpop.f32.mrb[19].mxu1  ;;  %v2863_v54 = vadd.f32 %v2862_v40, %v2861_v17  ;;  %v5740_v45 = vadd.f32 %v3510_v44, %v5596_v13  ;;  %v2821_v27 = vmul.f32 %v5729_v34, %v5729_v34 }
 0x44e   : > { %v2764_v1 = vsel %vm660_vm3, %v5725_v58, 0.0  ;;  %v2819_v36 = vmul.f32 %v5725_v58, %v5725_v58  ;;  %v5736_v22 = vadd.f32 %v5596_v13, %v2602_v30  ;;  %v2768_v6 = vsel %vm660_vm3, %v5729_v34, 0.0 }
 0x44f   : > { %v2765_v7 = vadd.f32 %v2764_v1, %v2763_v52  ;;  %v2865_v4 = vadd.f32 %v2864_v53, %v2863_v54  ;;  %v2822_v61 = vmul.f32 %v5740_v45, %v5740_v45  ;;  %v2770_v46 = vsel %vm660_vm3, %v5740_v45, 0.0 }
 0x450   : > { %v2866_v42 = vsel %vm660_vm3, %v2819_v36, 0.0  ;;  %v2766_v11 = vsel %vm660_vm3, %v5736_v22, 0.0  ;;  %v2820_v63 = vmul.f32 %v5736_v22, %v5736_v22  ;;  %v2870_v47 = vsel %vm660_vm3, %v2821_v27, 0.0 }
 0x451   : > { %v2767_v35 = vadd.f32 %v2766_v11, %v2765_v7  ;;  %v2867_v62 = vadd.f32 %v2866_v42, %v2865_v4  ;;  %v2872_v60 = vsel %vm660_vm3, %v2822_v61, 0.0 }
 0x452   : > { %v2868_v33 = vsel %vm660_vm3, %v2820_v63, 0.0  ;;  %v3513_v56 = vpop.f32.mrb[20].mxu1 }
 0x453   : > { %v2769_v16 = vadd.f32 %v2768_v6, %v2767_v35  ;;  %v2615_v3 = vpop.f32.mrb[21].mxu1  ;;  %v2869_v18 = vadd.f32 %v2868_v33, %v2867_v62  ;;  %v5761_v2 = vadd.f32 %v3513_v56, %v5596_v13 }
 0x454   : > { %v5757_v10 = vadd.f32 %v5596_v13, %v2615_v3  ;;  %v3514_v38 = vpop.f32.mrb[22].mxu1 }
 0x455   : > { %v2771_v28 = vadd.f32 %v2770_v46, %v2769_v16  ;;  %v2618_v15 = vpop.f32.mrb[23].mxu1  ;;  %v2871_v32 = vadd.f32 %v2870_v47, %v2869_v18  ;;  %v5772_v26 = vadd.f32 %v3514_v38, %v5596_v13  ;;  %v2825_v48 = vmul.f32 %v5761_v2, %v5761_v2 }
 0x456   : > { %v2772_v24 = vsel %vm660_vm3, %v5757_v10, 0.0  ;;  %v2823_v59 = vmul.f32 %v5757_v10, %v5757_v10  ;;  %v5768_v41 = vadd.f32 %v5596_v13, %v2618_v15  ;;  %v2776_v44 = vsel %vm660_vm3, %v5761_v2, 0.0 }
 0x457   : > { %v2773_v43 = vadd.f32 %v2772_v24, %v2771_v28  ;;  %v2873_v25 = vadd.f32 %v2872_v60, %v2871_v32  ;;  %v2826_v54 = vmul.f32 %v5772_v26, %v5772_v26  ;;  %v2778_v53 = vsel %vm660_vm3, %v5772_v26, 0.0 }
 0x458   : > { %v2874_v0 = vsel %vm660_vm3, %v2823_v59, 0.0  ;;  %v2774_v12 = vsel %vm660_vm3, %v5768_v41, 0.0  ;;  %v2824_v51 = vmul.f32 %v5768_v41, %v5768_v41  ;;  %v2878_v11 = vsel %vm660_vm3, %v2825_v48, 0.0 }
 0x459   : > { %v2775_v17 = vadd.f32 %v2774_v12, %v2773_v43  ;;  %v2875_v40 = vadd.f32 %v2874_v0, %v2873_v25  ;;  %v2880_v61 = vsel %vm660_vm3, %v2826_v54, 0.0 }
 0x45a   : > { %v2876_v52 = vsel %vm660_vm3, %v2824_v51, 0.0  ;;  %v3517_v30 = vpop.f32.mrb[24].mxu1 }
 0x45b   : > { %v2777_v1 = vadd.f32 %v2776_v44, %v2775_v17  ;;  %v2631_v36 = vpop.f32.mrb[25].mxu1  ;;  %v2877_v7 = vadd.f32 %v2876_v52, %v2875_v40  ;;  %v5793_v63 = vadd.f32 %v3517_v30, %v5596_v13 }
 0x45c   : > { %v5789_v4 = vadd.f32 %v5596_v13, %v2631_v36  ;;  %v3518_v42 = vpop.f32.mrb[26].mxu1 }
 0x45d   : > { %v2779_v27 = vadd.f32 %v2778_v53, %v2777_v1  ;;  %v2634_v35 = vpop.f32.mrb[27].mxu1  ;;  %v2879_v6 = vadd.f32 %v2878_v11, %v2877_v7  ;;  %v5804_v3 = vadd.f32 %v3518_v42, %v5596_v13  ;;  %v2829_v28 = vmul.f32 %v5793_v63, %v5793_v63 }
 0x45e   : > { %v2780_v62 = vsel %vm660_vm3, %v5789_v4, 0.0  ;;  %v2827_v33 = vmul.f32 %v5789_v4, %v5789_v4  ;;  %v5800_v56 = vadd.f32 %v5596_v13, %v2634_v35  ;;  %v2784_v32 = vsel %vm660_vm3, %v5793_v63, 0.0 }
 0x45f   : > { %v2781_v16 = vadd.f32 %v2780_v62, %v2779_v27  ;;  %v2881_v46 = vadd.f32 %v2880_v61, %v2879_v6  ;;  %v2830_v43 = vmul.f32 %v5804_v3, %v5804_v3  ;;  %v2786_v12 = vsel %vm660_vm3, %v5804_v3, 0.0 }
 0x460   : > { %v2882_v18 = vsel %vm660_vm3, %v2827_v33, 0.0  ;;  %v2782_v38 = vsel %vm660_vm3, %v5800_v56, 0.0  ;;  %v2828_v47 = vmul.f32 %v5800_v56, %v5800_v56  ;;  %v2886_v44 = vsel %vm660_vm3, %v2829_v28, 0.0 }
 0x461   : > { %v2783_v15 = vadd.f32 %v2782_v38, %v2781_v16  ;;  %v2883_v24 = vadd.f32 %v2882_v18, %v2881_v46  ;;  %v2888_v7 = vsel %vm660_vm3, %v2830_v43, 0.0 }
 0x462   : > { %v2884_v59 = vsel %vm660_vm3, %v2828_v47, 0.0  ;;  %v3521_v60 = vpop.f32.mrb[28].mxu1 }
 0x463   : > { %v2785_v25 = vadd.f32 %v2784_v32, %v2783_v15  ;;  %v2647_v0 = vpop.f32.mrb[29].mxu1  ;;  %v2885_v51 = vadd.f32 %v2884_v59, %v2883_v24  ;;  %v5825_v40 = vadd.f32 %v3521_v60, %v5596_v13 }
 0x464   : > { %v5821_v48 = vadd.f32 %v5596_v13, %v2647_v0  ;;  %v3522_v17 = vpop.f32.mrb[30].mxu1 }
 0x465   : > { %v2787_v52 = vadd.f32 %v2786_v12, %v2785_v25  ;;  %v2650_v30 = vpop.f32.mrb[31].mxu1  ;;  %v2887_v54 = vadd.f32 %v2886_v44, %v2885_v51  ;;  %v5836_v11 = vadd.f32 %v3522_v17, %v5596_v13  ;;  %v2833_v33 = vmul.f32 %v5825_v40, %v5825_v40 }
 0x466   : > { %v2788_v1 = vsel %vm660_vm3, %v5821_v48, 0.0  ;;  %v2831_v36 = vmul.f32 %v5821_v48, %v5821_v48  ;;  %v5832_v53 = vadd.f32 %v5596_v13, %v2650_v30  ;;  %v2792_v16 = vsel %vm660_vm3, %v5825_v40, 0.0 }
 0x467   : > { %v2789_v42 = vadd.f32 %v2788_v1, %v2787_v52  ;;  %v2889_v27 = vadd.f32 %v2888_v7, %v2887_v54  ;;  %v2834_v18 = vmul.f32 %v5836_v11, %v5836_v11  ;;  %v2794_v47 = vsel %vm660_vm3, %v5836_v11, 0.0 }
 0x468   : > { %v2890_v35 = vsel %vm660_vm3, %v2831_v36, 0.0  ;;  %v2790_v6 = vsel %vm660_vm3, %v5832_v53, 0.0  ;;  %v2832_v62 = vmul.f32 %v5832_v53, %v5832_v53  ;;  %v2894_v15 = vsel %vm660_vm3, %v2833_v33, 0.0 }
 0x469   : > { %v2791_v61 = vadd.f32 %v2790_v6, %v2789_v42  ;;  %v2891_v46 = vadd.f32 %v2890_v35, %v2889_v27  ;;  %v2896_v59 = vsel %vm660_vm3, %v2834_v18, 0.0 }
 0x46a   : > { %v2892_v13 = vsel %vm660_vm3, %v2832_v62, 0.0 }
 0x46b   : > { %v2793_v38 = vadd.f32 %v2792_v16, %v2791_v61  ;;  %v2893_v28 = vadd.f32 %v2892_v13, %v2891_v46 }
 0x46d   : > { %v2795_v32 = vadd.f32 %v2794_v47, %v2793_v38  ;;  %v2895_v24 = vadd.f32 %v2894_v15, %v2893_v28 }
 0x46f   : > { %v2796_v60 = vrot.slane %v2795_v32, 4  ;;  %v2897_v43 = vadd.f32 %v2896_v59, %v2895_v24 }
 0x471   : > { %v2797_v25 = vadd.f32 %v2796_v60, %v2795_v32  ;;  %v2898_v0 = vrot.slane %v2897_v43, 4 }
 0x473   : > { %v2798_v12 = vrot.slane %v2797_v25, 2  ;;  %v2899_v51 = vadd.f32 %v2898_v0, %v2897_v43 }
 0x475   : > { %v2799_v17 = vadd.f32 %v2798_v12, %v2797_v25  ;;  %v2900_v44 = vrot.slane %v2899_v51, 2 }
 0x477   : > { %v2800_v52 = vrot.slane %v2799_v17, 1  ;;  %v2901_v30 = vadd.f32 %v2900_v44, %v2899_v51 }
 0x479   : > { %v2801_v54 = vadd.f32 %v2800_v52, %v2799_v17  ;;  %v2902_v1 = vrot.slane %v2901_v30, 1 }
 0x47b   : > { %v5854_v36 = vmul.f32 0.00390625, %v2801_v54  ;;  %v2903_v7 = vadd.f32 %v2902_v1, %v2901_v30 }
 0x47d   : > { %v2905_v42 = vmul.f32 %v5854_v36, %v5854_v36  ;;  %v2904_v27 = vmul.f32 0.00390625, %v2903_v7  ;;  %v2916_v35 = vsub.f32 %v5672_v19, %v5854_v36  ;;  %v2919_v62 = vsub.f32 %v5693_v14, %v5854_v36 }
 0x47e   : > { %v2920_v33 = vsub.f32 %v5704_v57, %v5854_v36  ;;  %v2921_v61 = vsub.f32 %v5697_v8, %v5854_v36  ;;  %v2922_v16 = vsub.f32 %v5708_v55, %v5854_v36  ;;  %v2923_v46 = vsub.f32 %v5725_v58, %v5854_v36 }
 0x47f   : > { %v2906_v6 = vsub.f32 %v2904_v27, %v2905_v42  ;;  %v2924_v13 = vsub.f32 %v5736_v22, %v5854_v36  ;;  %v2925_v19 = vsub.f32 %v5729_v34, %v5854_v36  ;;  %v2926_v14 = vsub.f32 %v5740_v45, %v5854_v36 }
 0x480   : > { %v2927_v57 = vsub.f32 %v5757_v10, %v5854_v36  ;;  %v2928_v8 = vsub.f32 %v5768_v41, %v5854_v36  ;;  %v2929_v55 = vsub.f32 %v5761_v2, %v5854_v36  ;;  %v2930_v58 = vsub.f32 %v5772_v26, %v5854_v36 }
 0x481   : > { %v2931_v22 = vsub.f32 %v5789_v4, %v5854_v36  ;;  %v2932_v34 = vsub.f32 %v5800_v56, %v5854_v36  ;;  %v2933_v45 = vsub.f32 %v5793_v63, %v5854_v36  ;;  %v2934_v10 = vsub.f32 %v5804_v3, %v5854_v36 }
 0x482   : > { %v2935_v41 = vsub.f32 %v5821_v48, %v5854_v36  ;;  %v2936_v2 = vsub.f32 %v5832_v53, %v5854_v36  ;;  %v2937_v26 = vsub.f32 %v5825_v40, %v5854_v36  ;;  %v2938_v4 = vsub.f32 %v5836_v11, %v5854_v36 }
 0x483   : > { %v2939_v18 = vadd.f32 1e-05, %v2906_v6  ;;  %v2907_v63 = vsub.f32 %v5602_v20, %v5854_v36  ;;  %v2908_v56 = vsub.f32 %v5610_v23, %v5854_v36  ;;  %v2909_v3 = vsub.f32 %v5599_v5, %v5854_v36 }
 0x484   : > { %v2910_v48 = vsub.f32 %v5607_v29, %v5854_v36  ;;  %v2911_v40 = vsub.f32 %v5630_v37, %v5854_v36  ;;  %v2912_v53 = vsub.f32 %v5641_v39, %v5854_v36  ;;  %v2913_v11 = vsub.f32 %v5633_v50, %v5854_v36 }
 0x485   : > { %3675 = vrsqrt.f32 %v2939_v18  ;;  %v2914_v20 = vsub.f32 %v5644_v49, %v5854_v36  ;;  %v2915_v23 = vsub.f32 %v5661_v31, %v5854_v36  ;;  %v2917_v5 = vsub.f32 %v5665_v9, %v5854_v36 }
 0x486   : > { %v2918_v29 = vsub.f32 %v5676_v21, %v5854_v36 }
 0x48f   : > { %v3676_v38 = vpop.eup %3675 }
 0x490   : > { %v2941_v37 = vmul.f32 %v3676_v38, %v2907_v63  ;;  %v2942_v47 = vmul.f32 %v3676_v38, %v2908_v56  ;;  %v2943_v28 = vmul.f32 %v3676_v38, %v2909_v3  ;;  %v2944_v39 = vmul.f32 %v3676_v38, %v2910_v48  ;;  %v3687_v63 = vld [vmem:[%s3755_s27 + $0x50] sm:$0xff]  ;;  %v3688_v3 = vld [vmem:[%s3755_s27 + $0x58] sm:$0xff] }
 0x491   : > { %v2945_v15 = vmul.f32 %v3676_v38, %v2911_v40  ;;  %v2946_v32 = vmul.f32 %v3676_v38, %v2912_v53  ;;  %v2947_v50 = vmul.f32 %v3676_v38, %v2913_v11  ;;  %v2948_v24 = vmul.f32 %v3676_v38, %v2914_v20  ;;  %v6225_v40 = vld [vmem:[#allocation2_spill] sm:$0xff]  ;;  %v6226_v11 = vld [vmem:[#allocation3_spill] sm:$0xff]  ;;  %v6227_v20 = vld [vmem:[#allocation4_spill] sm:$0xff] }
 0x492   : > { %v2949_v59 = vmul.f32 %v3676_v38, %v2915_v23  ;;  %v2950_v60 = vmul.f32 %v3676_v38, %v2916_v35  ;;  %v2951_v49 = vmul.f32 %v3676_v38, %v2917_v5  ;;  %v2952_v43 = vmul.f32 %v3676_v38, %v2918_v29  ;;  %v6228_v5 = vld [vmem:[#allocation5_spill] sm:$0xff] }
 0x493   : > { %v2953_v25 = vmul.f32 %v3676_v38, %v2919_v62  ;;  %v2954_v31 = vmul.f32 %v3676_v38, %v2920_v33  ;;  %v2955_v0 = vmul.f32 %v3676_v38, %v2921_v61  ;;  %v2956_v9 = vmul.f32 %v3676_v38, %v2922_v16  ;;  %v3677_v33 = vld [vmem:[%s3755_s27] sm:$0xff]  ;;  %v3678_v16 = vld [vmem:[%s3755_s27 + $0x8] sm:$0xff] }
 0x494   : > { %v2957_v12 = vmul.f32 %v3676_v38, %v2923_v46  ;;  %v2958_v51 = vmul.f32 %v3676_v38, %v2924_v13  ;;  %v2959_v21 = vmul.f32 %v3676_v38, %v2925_v19  ;;  %v2960_v17 = vmul.f32 %v3676_v38, %v2926_v14  ;;  %v3679_v13 = vld [vmem:[%s3755_s27 + $0x10] sm:$0xff]  ;;  %v3680_v14 = vld [vmem:[%s3755_s27 + $0x18] sm:$0xff] }
 0x495   : > { %v2961_v44 = vmul.f32 %v3676_v38, %v2927_v57  ;;  %v2962_v52 = vmul.f32 %v3676_v38, %v2928_v8  ;;  %v2963_v30 = vmul.f32 %v3676_v38, %v2929_v55  ;;  %v2964_v54 = vmul.f32 %v3676_v38, %v2930_v58  ;;  %v3681_v8 = vld [vmem:[%s3755_s27 + $0x20] sm:$0xff]  ;;  %v3682_v58 = vld [vmem:[%s3755_s27 + $0x28] sm:$0xff] }
 0x496   : > { %v2965_v1 = vmul.f32 %v3676_v38, %v2931_v22  ;;  %v2966_v36 = vmul.f32 %v3676_v38, %v2932_v34  ;;  %v2967_v7 = vmul.f32 %v3676_v38, %v2933_v45  ;;  %v2968_v42 = vmul.f32 %v3676_v38, %v2934_v10  ;;  %v3683_v34 = vld [vmem:[%s3755_s27 + $0x30] sm:$0xff]  ;;  %v3684_v10 = vld [vmem:[%s3755_s27 + $0x38] sm:$0xff] }
 0x497   : > { %v5929_v27 = vmul.f32 %v3676_v38, %v2935_v41  ;;  %v5931_v35 = vmul.f32 %v3676_v38, %v2936_v2  ;;  %v5933_v6 = vmul.f32 %v3676_v38, %v2937_v26  ;;  %v5935_v62 = vmul.f32 %v3676_v38, %v2938_v4  ;;  %v3685_v2 = vld [vmem:[%s3755_s27 + $0x40] sm:$0xff]  ;;  %v3686_v4 = vld [vmem:[%s3755_s27 + $0x48] sm:$0xff] }
 0x498   : > { %v2973_v61 = vadd.f32 %v3677_v33, %v2941_v37  ;;  %v2974_v46 = vadd.f32 %v3678_v16, %v2942_v47  ;;  %v2975_v19 = vadd.f32 %v3679_v13, %v2943_v28  ;;  %v2976_v57 = vadd.f32 %v3680_v14, %v2944_v39  ;;  %v6229_v37 = vld [vmem:[#allocation6_spill] sm:$0xff]  ;;  %v6230_v28 = vld [vmem:[#allocation7_spill] sm:$0xff]  ;;  %v6244_v16 = vld [vmem:[#allocation21_spill] sm:$0xff] }
 0x499   : > { %v2977_v55 = vadd.f32 %v3681_v8, %v2945_v15  ;;  %v2978_v22 = vadd.f32 %v3682_v58, %v2946_v32  ;;  %v2979_v45 = vadd.f32 %v3683_v34, %v2947_v50  ;;  %v2980_v41 = vadd.f32 %v3684_v10, %v2948_v24  ;;  %v6231_v15 = vld [vmem:[#allocation8_spill] sm:$0xff]  ;;  %v6232_v50 = vld [vmem:[#allocation9_spill] sm:$0xff] }
 0x49a   : > { %v2981_v26 = vadd.f32 %v3685_v2, %v2949_v59  ;;  %v2982_v18 = vadd.f32 %v3686_v4, %v2950_v60  ;;  %v2983_v56 = vadd.f32 %v3687_v63, %v2951_v49  ;;  %v2984_v48 = vadd.f32 %v3688_v3, %v2952_v43  ;;  %3005 = vst.msk [vmem:[%s5927_s21] sm:$0xff] %vm660_vm3, %v2973_v61  ;;  %v6233_v59 = vld [vmem:[#allocation10_spill] sm:$0xff]  ;;  %v6234_v49 = vld [vmem:[#allocation11_spill] sm:$0xff] }
 0x49b   : > { %3006 = vst.msk [vmem:[%s5927_s21 + $0x8] sm:$0xff] %vm660_vm3, %v2974_v46  ;;  %3007 = vst.msk [vmem:[%s5927_s21 + $0x10] sm:$0xff] %vm660_vm3, %v2975_v19  ;;  %v2985_v53 = vadd.f32 %v2953_v25, %v6225_v40  ;;  %v2986_v38 = vadd.f32 %v2954_v31, %v6226_v11  ;;  %v2987_v23 = vadd.f32 %v2955_v0, %v6227_v20  ;;  %v6235_v25 = vld [vmem:[#allocation12_spill] sm:$0xff]  ;;  %v6236_v0 = vld [vmem:[#allocation13_spill] sm:$0xff] }
 0x49c   : > { %3008 = vst.msk [vmem:[%s5927_s21 + $0x18] sm:$0xff] %vm660_vm3, %v2976_v57  ;;  %v2988_v29 = vadd.f32 %v2956_v9, %v6228_v5  ;;  %3009 = vst.msk [vmem:[%s5927_s21 + $0x20] sm:$0xff] %vm660_vm3, %v2977_v55  ;;  %v2989_v47 = vadd.f32 %v2957_v12, %v6229_v37  ;;  %v2990_v39 = vadd.f32 %v2958_v51, %v6230_v28  ;;  %v6237_v12 = vld [vmem:[#allocation14_spill] sm:$0xff] }
 0x49d   : > { %3010 = vst.msk [vmem:[%s5927_s21 + $0x28] sm:$0xff] %vm660_vm3, %v2978_v22  ;;  %3011 = vst.msk [vmem:[%s5927_s21 + $0x30] sm:$0xff] %vm660_vm3, %v2979_v45  ;;  %v2991_v32 = vadd.f32 %v2959_v21, %v6231_v15  ;;  %v2992_v24 = vadd.f32 %v2960_v17, %v6232_v50  ;;  %v2993_v60 = vadd.f32 %v2961_v44, %v6233_v59  ;;  %v6238_v21 = vld [vmem:[#allocation15_spill] sm:$0xff]  ;;  %v6239_v44 = vld [vmem:[#allocation16_spill] sm:$0xff] }
 0x49e   : > { %3012 = vst.msk [vmem:[%s5927_s21 + $0x38] sm:$0xff] %vm660_vm3, %v2980_v41  ;;  %3013 = vst.msk [vmem:[%s5927_s21 + $0x40] sm:$0xff] %vm660_vm3, %v2981_v26  ;;  %v2994_v43 = vadd.f32 %v2962_v52, %v6234_v49  ;;  %v2995_v31 = vadd.f32 %v2963_v30, %v6235_v25  ;;  %v2996_v9 = vadd.f32 %v2964_v54, %v6236_v0  ;;  %v6240_v30 = vld [vmem:[#allocation17_spill] sm:$0xff] }
 0x49f   : > { %3014 = vst.msk [vmem:[%s5927_s21 + $0x48] sm:$0xff] %vm660_vm3, %v2982_v18  ;;  %3015 = vst.msk [vmem:[%s5927_s21 + $0x50] sm:$0xff] %vm660_vm3, %v2983_v56  ;;  %v2997_v51 = vadd.f32 %v2965_v1, %v6237_v12  ;;  %v2998_v17 = vadd.f32 %v2966_v36, %v6238_v21  ;;  %v2999_v52 = vadd.f32 %v2967_v7, %v6239_v44  ;;  %v6241_v1 = vld [vmem:[#allocation18_spill] sm:$0xff]  ;;  %v6242_v7 = vld [vmem:[#allocation19_spill] sm:$0xff] }
 0x4a0   : > { %3016 = vst.msk [vmem:[%s5927_s21 + $0x58] sm:$0xff] %vm660_vm3, %v2984_v48  ;;  %3017 = vst.msk [vmem:[%s5927_s21 + $0x60] sm:$0xff] %vm660_vm3, %v2985_v53  ;;  %v3000_v54 = vadd.f32 %v2968_v42, %v6240_v30  ;;  %v3001_v36 = vadd.f32 %v5929_v27, %v6241_v1  ;;  %v3002_v33 = vadd.f32 %v5931_v35, %v6242_v7  ;;  %v6243_v42 = vld [vmem:[#allocation20_spill] sm:$0xff] }
 0x4a1   : > { %3018 = vst.msk [vmem:[%s5927_s21 + $0x68] sm:$0xff] %vm660_vm3, %v2986_v38  ;;  %3019 = vst.msk [vmem:[%s5927_s21 + $0x70] sm:$0xff] %vm660_vm3, %v2987_v23  ;;  %v3003_v61 = vadd.f32 %v5933_v6, %v6243_v42  ;;  %v3004_v46 = vadd.f32 %v5935_v62, %v6244_v16 }
 0x4a2   : > { %3020 = vst.msk [vmem:[%s5927_s21 + $0x78] sm:$0xff] %vm660_vm3, %v2988_v29  ;;  %3021 = vst.msk [vmem:[%s5927_s21 + $0x80] sm:$0xff] %vm660_vm3, %v2989_v47 }
 0x4a3   : > { %3022 = vst.msk [vmem:[%s5927_s21 + $0x88] sm:$0xff] %vm660_vm3, %v2990_v39  ;;  %3023 = vst.msk [vmem:[%s5927_s21 + $0x90] sm:$0xff] %vm660_vm3, %v2991_v32 }
 0x4a4   : > { %3024 = vst.msk [vmem:[%s5927_s21 + $0x98] sm:$0xff] %vm660_vm3, %v2992_v24  ;;  %3025 = vst.msk [vmem:[%s5927_s21 + $0xa0] sm:$0xff] %vm660_vm3, %v2993_v60 }
 0x4a5   : > { %3026 = vst.msk [vmem:[%s5927_s21 + $0xa8] sm:$0xff] %vm660_vm3, %v2994_v43  ;;  %3027 = vst.msk [vmem:[%s5927_s21 + $0xb0] sm:$0xff] %vm660_vm3, %v2995_v31 }
 0x4a6   : > { %3028 = vst.msk [vmem:[%s5927_s21 + $0xb8] sm:$0xff] %vm660_vm3, %v2996_v9  ;;  %3029 = vst.msk [vmem:[%s5927_s21 + $0xc0] sm:$0xff] %vm660_vm3, %v2997_v51 }
 0x4a7   : > { %3030 = vst.msk [vmem:[%s5927_s21 + $0xc8] sm:$0xff] %vm660_vm3, %v2998_v17  ;;  %3031 = vst.msk [vmem:[%s5927_s21 + $0xd0] sm:$0xff] %vm660_vm3, %v2999_v52 }
 0x4a8   : > { %3032 = vst.msk [vmem:[%s5927_s21 + $0xd8] sm:$0xff] %vm660_vm3, %v3000_v54  ;;  %3033 = vst.msk [vmem:[%s5927_s21 + $0xe0] sm:$0xff] %vm660_vm3, %v3001_v36 }
 0x4a9   : > { %3034 = vst.msk [vmem:[%s5927_s21 + $0xe8] sm:$0xff] %vm660_vm3, %v3002_v33  ;;  %3035 = vst.msk [vmem:[%s5927_s21 + $0xf0] sm:$0xff] %vm660_vm3, %v3003_v61 }
 0x4aa   : > { %3036 = vst.msk [vmem:[%s5927_s21 + $0xf8] sm:$0xff] %vm660_vm3, %v3004_v46 }
 0x4ab PF: > { %s15_s18 = sadd.s32 1, %s3695_s18  }
 0x4ac   : > { %p12_p4 = scmp.ge.s32.totalorder %s15_s18, 4  }
 0x4ae   :  { %14 = sbr.rel (!%p12_p4) target bundleno = 1 (0x1), region = 74 }

</bundles_post_ra>
